<compile_context>
chip_gen: v7x
topology: tpu7x:2x2x1
jax: 0.10.0
libtpu: 0.0.40
codegen_flags: <defaults>
</compile_context>

<pallas_src>
import functools

import jax
import jax.numpy as jnp
from jax import lax
from jax.experimental import pallas as pl
from jax.experimental.pallas import tpu as pltpu


def _round_up(x, m):
    return (x + m - 1) // m * m


def _vmem_capacity_bytes():
    try:
        info = pltpu.get_tpu_info()
        return int(getattr(info, "vmem_capacity_bytes", 64 * 1024 * 1024))
    except Exception:
        return 64 * 1024 * 1024


# ----------------------------------------------------------------------------
# Fused kernel: 3x3 spatial conv + BN + ReLU  ->  (kT,1,1) temporal conv + BN + ReLU
# ----------------------------------------------------------------------------
def _sepconv3d_kernel(x_ref, ws_ref, wt_ref, shs_ref, sht_ref, ml_ref, mr_ref,
                      o_ref, col_s, y_s, *, D, W, Cin, Cout, kT, sT, pT,
                      Ppad, TD_in, TD_out):
    # x_ref : (1, D, Cin, L) bf16   channels-second, H-haloed, pixel-flat input
    # ws_ref: (Cout, 9*Cin)  bf16   spatial weight (BN scale folded)
    # wt_ref: (kT, Cout, Cout) bf16 temporal weight [kt, out, in] (scale folded)
    # shs/sht: (Cout, 1) f32        BN shifts
    # ml/mr : (1, Ppad) bf16        0/1 masks for the dx=0 / dx=2 W-boundary
    # o_ref : (1, Cout, TD_out, Ppad) f32   output chunk (NCDHW-ordered)
    # col_s : VMEM (9*Cin, Ppad) bf16       im2col scratch (pixels on lanes)
    # y_s   : VMEM (TD_in, Cout, Ppad) bf16 stage-1 activations for this chunk
    c0 = pl.program_id(1) * TD_out        # first output frame of this chunk
    f0 = c0 * sT - pT                     # first (temporally padded) input frame

    ws = ws_ref[...]                      # hoisted out of all loops
    shift_s = shs_ref[...]                # (Cout, 1) f32
    shift_t = sht_ref[...]                # (Cout, 1) f32
    mask_l = ml_ref[...]                  # (1, Ppad) bf16
    mask_r = mr_ref[...]                  # (1, Ppad) bf16

    # ---------------- stage 1: spatial conv (+folded BN scale) + shift + ReLU
    def stage1(j, carry):
        f = f0 + j                        # global input frame (may be out of range)
        fc = jnp.clip(f, 0, D - 1)        # safe read index
        # Pack the 9 shifted taps as full-lane-width ROW blocks of col_s.
        for dy in range(3):
            for dx in range(3):
                slab = x_ref[0, fc, :, pl.ds(dy * W + dx, Ppad)]   # (Cin, Ppad)
                if dx == 0:
                    slab = slab * mask_l          # zero wrapped w == 0 column
                elif dx == 2:
                    slab = slab * mask_r          # zero wrapped w == W-1 column
                jj = dy * 3 + dx
                col_s[jj * Cin:(jj + 1) * Cin, :] = slab
        # One MXU pass, transpose-free: (Cout,9Cin) x (9Cin,Ppad) -> (Cout,Ppad)
        acc = lax.dot_general(ws, col_s[...], (((1,), (0,)), ((), ())),
                              preferred_element_type=jnp.float32)
        z = jnp.maximum(acc + shift_s, 0.0)
        # Out-of-range frames become exact zeros == the temporal zero padding.
        valid = jnp.logical_and(f >= 0, f < D).astype(jnp.float32)
        y_s[j] = (z * valid).astype(jnp.bfloat16)
        return carry

    lax.fori_loop(0, TD_in, stage1, 0)

    # ---------------- stage 2: temporal (kT,1,1) conv + shift + ReLU ---------
    for i in range(TD_out):               # bounded static unroll (<= chunk size)
        acc = jnp.zeros((Cout, Ppad), jnp.float32)
        for kt in range(kT):
            acc = acc + jnp.dot(wt_ref[kt], y_s[i * sT + kt],
                                preferred_element_type=jnp.float32)
        o_ref[0, :, i, :] = jnp.maximum(acc + shift_t, 0.0)


# ----------------------------------------------------------------------------
# Wrapper: SepConv3d_rm forward
# ----------------------------------------------------------------------------
def sep_conv3d_rm(x_ncdhw, params, *, kernel_size, stride, padding):
    """x_ncdhw: (N, Cin, D, H, W) float32, PyTorch layout."""
    N, Cin, D, H, W = x_ncdhw.shape
    w_s = params["w_s"]                   # (Cout, Cin, 1, 3, 3)
    w_t = params["w_t"]                   # (Cout, Cout, kT, 1, 1)
    Cout = w_s.shape[0]
    eps = 1e-3
    kT, sT, pT = kernel_size, stride, padding
    D_out = (D + 2 * pT - kT) // sT + 1
    P = H * W
    Ppad = _round_up(P, 128)              # lane-dense flat pixel axis (item 12)

    # Fold eval-mode BN into per-channel scale (into the weights) + shift.
    scale_s = params["gamma_s"] / jnp.sqrt(params["var_s"] + eps)
    shift_s = params["beta_s"] - params["mean_s"] * scale_s
    scale_t = params["gamma_t"] / jnp.sqrt(params["var_t"] + eps)
    shift_t = params["beta_t"] - params["mean_t"] * scale_t

    # (Cout, Cin, 1, 3, 3) -> (Cout, 3, 3, Cin) -> (Cout, 9*Cin); column order
    # (dy*3+dx)*Cin + ci matches the in-kernel col_s row blocks.
    ws = (jnp.transpose(w_s[:, :, 0], (0, 2, 3, 1)).reshape(Cout, 9 * Cin)
          * scale_s[:, None]).astype(jnp.bfloat16)
    # (Cout, Cout, kT, 1, 1) -> (kT, Cout_out, Cout_in), scale folded.
    wt = (jnp.transpose(w_t[:, :, :, 0, 0], (2, 0, 1))
          * scale_t[None, :, None]).astype(jnp.bfloat16)

    # Channels-second, H-haloed, pixel-flat, bf16 input (one fused XLA pass):
    #   (N,Cin,D,H,W) -> (N,D,Cin,H,W) -> pad H by 1 -> flat (H+2)*W ->
    #   pad flat axis by (1, Ppad-P+1) slack for the static tap offsets.
    x_t = jnp.transpose(x_ncdhw, (0, 2, 1, 3, 4))
    x_t = jnp.pad(x_t, ((0, 0), (0, 0), (0, 0), (1, 1), (0, 0)))
    x_f = x_t.reshape(N, D, Cin, (H + 2) * W)
    right = (Ppad - P) + 1
    x_f = jnp.pad(x_f, ((0, 0), (0, 0), (0, 0), (1, right))).astype(jnp.bfloat16)
    L = (H + 2) * W + 1 + right

    # 0/1 masks killing the W-boundary wraparound of the dx=0 / dx=2 taps.
    pcol = jnp.arange(Ppad, dtype=jnp.int32) % W
    mask_l = (pcol != 0).astype(jnp.bfloat16).reshape(1, Ppad)
    mask_r = (pcol != (W - 1)).astype(jnp.bfloat16).reshape(1, Ppad)

    # --- output-frame chunking from a generation-aware VMEM budget ----------
    cap = _vmem_capacity_bytes()
    budget = int(cap * 0.40)

    def vmem_est(td_out):
        td_in = (td_out - 1) * sT + kT
        return (2 * D * Cin * L * 2                  # x block (double-buffered, bf16)
                + 9 * Cin * Ppad * 2                 # col_s
                + td_in * Cout * Ppad * 2            # y_s
                + 2 * Cout * td_out * Ppad * 4       # out block (double-buffered)
                + (Cout * 9 * Cin + kT * Cout * Cout) * 2)

    if D_out <= 16 and vmem_est(D_out) <= budget:
        TD_out = D_out
    else:
        TD_out = None
        td = 8
        while td <= min(D_out, 16):
            if vmem_est(td) <= budget:
                TD_out = td
            td += 8
        if TD_out is None:
            TD_out = D_out if D_out <= 8 else 8
    NC = -(-D_out // TD_out)
    D_out_pad = NC * TD_out
    TD_in = (TD_out - 1) * sT + kT

    kernel = functools.partial(
        _sepconv3d_kernel, D=D, W=W, Cin=Cin, Cout=Cout, kT=kT, sT=sT, pT=pT,
        Ppad=Ppad, TD_in=TD_in, TD_out=TD_out)

    out = pl.pallas_call(
        kernel,
        out_shape=jax.ShapeDtypeStruct((N, Cout, D_out_pad, Ppad), jnp.float32),
        grid_spec=pltpu.PrefetchScalarGridSpec(
            num_scalar_prefetch=0,
            grid=(N, NC),
            in_specs=[
                # Full per-sample input block; constant over the chunk axis so
                # it stays resident while c varies.
                pl.BlockSpec((1, D, Cin, L), lambda n, c: (n, 0, 0, 0)),
                pl.BlockSpec((Cout, 9 * Cin), lambda n, c: (0, 0)),
                pl.BlockSpec((kT, Cout, Cout), lambda n, c: (0, 0, 0)),
                pl.BlockSpec((Cout, 1), lambda n, c: (0, 0)),
                pl.BlockSpec((Cout, 1), lambda n, c: (0, 0)),
                pl.BlockSpec((1, Ppad), lambda n, c: (0, 0)),
                pl.BlockSpec((1, Ppad), lambda n, c: (0, 0)),
            ],
            out_specs=pl.BlockSpec((1, Cout, TD_out, Ppad),
                                   lambda n, c: (n, 0, c, 0)),
            scratch_shapes=[
                pltpu.VMEM((9 * Cin, Ppad), jnp.bfloat16),       # im2col
                pltpu.VMEM((TD_in, Cout, Ppad), jnp.bfloat16),   # stage-1 acts
            ],
        ),
        compiler_params=pltpu.CompilerParams(
            dimension_semantics=("parallel", "parallel"),
            vmem_limit_bytes=min(int(cap * 0.75), 100 * 1024 * 1024)),
    )(x_f, ws, wt,
      shift_s.reshape(Cout, 1).astype(jnp.float32),
      shift_t.reshape(Cout, 1).astype(jnp.float32),
      mask_l, mask_r)

    # (N, Cout, D_out_pad, Ppad) -> crop pads -> NCDHW (free when no padding).
    return out[:, :, :D_out, :P].reshape(N, Cout, D_out, H, W)


# ----------------------------------------------------------------------------
# Pure-JAX reference (for the correctness check)
# ----------------------------------------------------------------------------
def sep_conv3d_rm_ref(x, params, *, kernel_size, stride, padding):
    eps = 1e-3
    dn = ("NCDHW", "OIDHW", "NCDHW")
    y = lax.conv_general_dilated(x, params["w_s"], (1, 1, 1),
                                 ((0, 0), (1, 1), (1, 1)), dimension_numbers=dn)
    y = ((y - params["mean_s"][None, :, None, None, None])
         / jnp.sqrt(params["var_s"][None, :, None, None, None] + eps)
         * params["gamma_s"][None, :, None, None, None]
         + params["beta_s"][None, :, None, None, None])
    y = jnp.maximum(y, 0.0)
    y = lax.conv_general_dilated(y, params["w_t"], (stride, 1, 1),
                                 ((padding, padding), (0, 0), (0, 0)),
                                 dimension_numbers=dn)
    y = ((y - params["mean_t"][None, :, None, None, None])
         / jnp.sqrt(params["var_t"][None, :, None, None, None] + eps)
         * params["gamma_t"][None, :, None, None, None]
         + params["beta_t"][None, :, None, None, None])
    return jnp.maximum(y, 0.0)


if __name__ == "__main__":
    # Small, module-consistent shapes.
    N, Cin, Cout = 2, 4, 8
    D, H, W = 8, 16, 16
    kernel_size = 3

    key = jax.random.PRNGKey(0)
    k_x, k_ws, k_wt = jax.random.split(key, 3)

    x = jax.random.normal(k_x, (N, Cin, D, H, W), dtype=jnp.float32)

    params = {
        "w_s": 0.1 * jax.random.normal(k_ws, (Cout, Cin, 1, 3, 3), jnp.float32),
        "w_t": 0.1 * jax.random.normal(k_wt, (Cout, Cout, kernel_size, 1, 1),
                                       jnp.float32),
        "gamma_s": 1.0 + 0.01 * jnp.arange(Cout, dtype=jnp.float32),
        "beta_s": 0.02 * jnp.arange(Cout, dtype=jnp.float32),
        "mean_s": 0.05 * jnp.arange(Cout, dtype=jnp.float32),
        "var_s": 1.0 + 0.1 * jnp.arange(Cout, dtype=jnp.float32),
        "gamma_t": 1.0 - 0.01 * jnp.arange(Cout, dtype=jnp.float32),
        "beta_t": -0.02 * jnp.arange(Cout, dtype=jnp.float32),
        "mean_t": 0.03 * jnp.arange(Cout, dtype=jnp.float32),
        "var_t": 1.0 + 0.05 * jnp.arange(Cout, dtype=jnp.float32),
    }

    # bf16 internals with f32 accumulation -> relaxed tolerance (per review).
    ATOL = RTOL = 3e-2

    # Config 1: kernel_size=3, stride=1, padding=1
    out = sep_conv3d_rm(x, params, kernel_size=3, stride=1, padding=1)
    out = jax.block_until_ready(out)
    ref = sep_conv3d_rm_ref(x, params, kernel_size=3, stride=1, padding=1)
    assert out.shape == ref.shape, (out.shape, ref.shape)
    assert jnp.allclose(out, ref, atol=ATOL, rtol=RTOL), (
        float(jnp.max(jnp.abs(out - ref))))

    # Config 2: kernel_size=3, stride=2, padding=0 (strided temporal path)
    out2 = sep_conv3d_rm(x, params, kernel_size=3, stride=2, padding=0)
    out2 = jax.block_until_ready(out2)
    ref2 = sep_conv3d_rm_ref(x, params, kernel_size=3, stride=2, padding=0)
    assert out2.shape == ref2.shape, (out2.shape, ref2.shape)
    assert jnp.allclose(out2, ref2, atol=ATOL, rtol=RTOL), (
        float(jnp.max(jnp.abs(out2 - ref2))))

    print("KERNEL_OK")
</pallas_src>

<mosaic_0001>
module attributes {stable_mosaic.version = 11 : i64} {
  func.func @_sepconv3d_kernel(%arg0: i32, %arg1: i32, %arg2: memref<1x8x4x290xbf16, #tpu.memory_space<vmem>>, %arg3: memref<8x36xbf16, #tpu.memory_space<vmem>>, %arg4: memref<3x8x8xbf16, #tpu.memory_space<vmem>>, %arg5: memref<8x1xf32, #tpu.memory_space<vmem>>, %arg6: memref<8x1xf32, #tpu.memory_space<vmem>>, %arg7: memref<1x256xbf16, #tpu.memory_space<vmem>>, %arg8: memref<1x256xbf16, #tpu.memory_space<vmem>>, %arg9: memref<1x8x8x256xf32, #tpu.memory_space<vmem>>, %arg10: memref<36x256xbf16, #tpu.memory_space<vmem>>, %arg11: memref<10x8x256xbf16, #tpu.memory_space<vmem>>) attributes {dimension_semantics = [#tpu.dimension_semantics<parallel>, #tpu.dimension_semantics<parallel>], iteration_bounds = array<i64: 2, 1>, scalar_prefetch = 0 : i64, scratch_operands = 2 : i64, tpu.core_type = #tpu.core_type<tc>, window_params = [{transform_indices = @transform_0, window_bounds = array<i64: 1, 8, 4, 290>}, {pipeline_mode = #tpu.pipeline_mode<synchronous>, transform_indices = @transform_1, window_bounds = array<i64: 8, 36>}, {pipeline_mode = #tpu.pipeline_mode<synchronous>, transform_indices = @transform_2, window_bounds = array<i64: 3, 8, 8>}, {pipeline_mode = #tpu.pipeline_mode<synchronous>, transform_indices = @transform_3, window_bounds = array<i64: 8, 1>}, {pipeline_mode = #tpu.pipeline_mode<synchronous>, transform_indices = @transform_4, window_bounds = array<i64: 8, 1>}, {pipeline_mode = #tpu.pipeline_mode<synchronous>, transform_indices = @transform_5, window_bounds = array<i64: 1, 256>}, {pipeline_mode = #tpu.pipeline_mode<synchronous>, transform_indices = @transform_6, window_bounds = array<i64: 1, 256>}, {transform_indices = @transform_7, window_bounds = array<i64: 1, 8, 8, 256>}]} {
    %c8_i32 = arith.constant 8 : i32
    %0 = arith.muli %arg1, %c8_i32 : i32
    %c1_i32 = arith.constant 1 : i32
    %1 = arith.muli %0, %c1_i32 : i32
    %c1_i32_0 = arith.constant 1 : i32
    %2 = arith.subi %1, %c1_i32_0 : i32
    %c0 = arith.constant 0 : index
    %c0_1 = arith.constant 0 : index
    %3 = vector.load %arg3[%c0, %c0_1] : memref<8x36xbf16, #tpu.memory_space<vmem>>, vector<8x36xbf16>
    %c0_2 = arith.constant 0 : index
    %c0_3 = arith.constant 0 : index
    %4 = vector.load %arg5[%c0_2, %c0_3] : memref<8x1xf32, #tpu.memory_space<vmem>>, vector<8x1xf32>
    %c0_4 = arith.constant 0 : index
    %c0_5 = arith.constant 0 : index
    %5 = vector.load %arg6[%c0_4, %c0_5] : memref<8x1xf32, #tpu.memory_space<vmem>>, vector<8x1xf32>
    %c0_6 = arith.constant 0 : index
    %c0_7 = arith.constant 0 : index
    %6 = vector.load %arg7[%c0_6, %c0_7] : memref<1x256xbf16, #tpu.memory_space<vmem>>, vector<1x256xbf16>
    %c0_8 = arith.constant 0 : index
    %c0_9 = arith.constant 0 : index
    %7 = vector.load %arg8[%c0_8, %c0_9] : memref<1x256xbf16, #tpu.memory_space<vmem>>, vector<1x256xbf16>
    %c0_i32 = arith.constant 0 : i32
    %c10_i32 = arith.constant 10 : i32
    %8 = arith.addi %c0_i32, %c10_i32 : i32
    %c1_i32_10 = arith.constant 1 : i32
    scf.for %arg12 = %c0_i32 to %8 step %c1_i32_10  : i32 {
      %217 = arith.addi %2, %arg12 : i32
      %c0_i32_218 = arith.constant 0 : i32
      %c7_i32 = arith.constant 7 : i32
      %218 = arith.maxsi %c0_i32_218, %217 : i32
      %219 = arith.minsi %c7_i32, %218 : i32
      %c0_219 = arith.constant 0 : index
      %220 = arith.index_cast %219 : i32 to index
      %c0_220 = arith.constant 0 : index
      %c0_221 = arith.constant 0 : index
      %221 = vector.load %arg2[%c0_219, %220, %c0_220, %c0_221] : memref<1x8x4x290xbf16, #tpu.memory_space<vmem>>, vector<1x1x4x256xbf16>
      %222 = vector.shape_cast %221 : vector<1x1x4x256xbf16> to vector<4x256xbf16>
      %223 = vector.broadcast %6 : vector<1x256xbf16> to vector<4x256xbf16>
      %224 = arith.mulf %222, %223 : vector<4x256xbf16>
      %c0_222 = arith.constant 0 : index
      %c0_223 = arith.constant 0 : index
      %225 = vector.load %arg10[%c0_222, %c0_223] : memref<36x256xbf16, #tpu.memory_space<vmem>>, vector<4x256xbf16>
      tpu.vector_store %arg10[%c0_222, %c0_223], %224 {strides = array<i32>} : memref<36x256xbf16, #tpu.memory_space<vmem>>, vector<4x256xbf16>,
      %c0_224 = arith.constant 0 : index
      %226 = arith.index_cast %219 : i32 to index
      %c0_225 = arith.constant 0 : index
      %c1_226 = arith.constant 1 : index
      %227 = vector.load %arg2[%c0_224, %226, %c0_225, %c1_226] : memref<1x8x4x290xbf16, #tpu.memory_space<vmem>>, vector<1x1x4x256xbf16>
      %228 = vector.shape_cast %227 : vector<1x1x4x256xbf16> to vector<4x256xbf16>
      %c4_227 = arith.constant 4 : index
      %c0_228 = arith.constant 0 : index
      %229 = vector.load %arg10[%c4_227, %c0_228] : memref<36x256xbf16, #tpu.memory_space<vmem>>, vector<4x256xbf16>
      tpu.vector_store %arg10[%c4_227, %c0_228], %228 {strides = array<i32>} : memref<36x256xbf16, #tpu.memory_space<vmem>>, vector<4x256xbf16>,
      %c0_229 = arith.constant 0 : index
      %230 = arith.index_cast %219 : i32 to index
      %c0_230 = arith.constant 0 : index
      %c2_231 = arith.constant 2 : index
      %231 = vector.load %arg2[%c0_229, %230, %c0_230, %c2_231] : memref<1x8x4x290xbf16, #tpu.memory_space<vmem>>, vector<1x1x4x256xbf16>
      %232 = vector.shape_cast %231 : vector<1x1x4x256xbf16> to vector<4x256xbf16>
      %233 = vector.broadcast %7 : vector<1x256xbf16> to vector<4x256xbf16>
      %234 = arith.mulf %232, %233 : vector<4x256xbf16>
      %c8_232 = arith.constant 8 : index
      %c0_233 = arith.constant 0 : index
      %235 = vector.load %arg10[%c8_232, %c0_233] : memref<36x256xbf16, #tpu.memory_space<vmem>>, vector<4x256xbf16>
      tpu.vector_store %arg10[%c8_232, %c0_233], %234 {strides = array<i32>} : memref<36x256xbf16, #tpu.memory_space<vmem>>, vector<4x256xbf16>,
      %c0_234 = arith.constant 0 : index
      %236 = arith.index_cast %219 : i32 to index
      %c0_235 = arith.constant 0 : index
      %c16 = arith.constant 16 : index
      %237 = vector.load %arg2[%c0_234, %236, %c0_235, %c16] : memref<1x8x4x290xbf16, #tpu.memory_space<vmem>>, vector<1x1x4x256xbf16>
      %238 = vector.shape_cast %237 : vector<1x1x4x256xbf16> to vector<4x256xbf16>
      %239 = vector.broadcast %6 : vector<1x256xbf16> to vector<4x256xbf16>
      %240 = arith.mulf %238, %239 : vector<4x256xbf16>
      %c12 = arith.constant 12 : index
      %c0_236 = arith.constant 0 : index
      %241 = vector.load %arg10[%c12, %c0_236] : memref<36x256xbf16, #tpu.memory_space<vmem>>, vector<4x256xbf16>
      tpu.vector_store %arg10[%c12, %c0_236], %240 {strides = array<i32>} : memref<36x256xbf16, #tpu.memory_space<vmem>>, vector<4x256xbf16>,
      %c0_237 = arith.constant 0 : index
      %242 = arith.index_cast %219 : i32 to index
      %c0_238 = arith.constant 0 : index
      %c17 = arith.constant 17 : index
      %243 = vector.load %arg2[%c0_237, %242, %c0_238, %c17] : memref<1x8x4x290xbf16, #tpu.memory_space<vmem>>, vector<1x1x4x256xbf16>
      %244 = vector.shape_cast %243 : vector<1x1x4x256xbf16> to vector<4x256xbf16>
      %c16_239 = arith.constant 16 : index
      %c0_240 = arith.constant 0 : index
      %245 = vector.load %arg10[%c16_239, %c0_240] : memref<36x256xbf16, #tpu.memory_space<vmem>>, vector<4x256xbf16>
      tpu.vector_store %arg10[%c16_239, %c0_240], %244 {strides = array<i32>} : memref<36x256xbf16, #tpu.memory_space<vmem>>, vector<4x256xbf16>,
      %c0_241 = arith.constant 0 : index
      %246 = arith.index_cast %219 : i32 to index
      %c0_242 = arith.constant 0 : index
      %c18 = arith.constant 18 : index
      %247 = vector.load %arg2[%c0_241, %246, %c0_242, %c18] : memref<1x8x4x290xbf16, #tpu.memory_space<vmem>>, vector<1x1x4x256xbf16>
      %248 = vector.shape_cast %247 : vector<1x1x4x256xbf16> to vector<4x256xbf16>
      %249 = vector.broadcast %7 : vector<1x256xbf16> to vector<4x256xbf16>
      %250 = arith.mulf %248, %249 : vector<4x256xbf16>
      %c20 = arith.constant 20 : index
      %c0_243 = arith.constant 0 : index
      %251 = vector.load %arg10[%c20, %c0_243] : memref<36x256xbf16, #tpu.memory_space<vmem>>, vector<4x256xbf16>
      tpu.vector_store %arg10[%c20, %c0_243], %250 {strides = array<i32>} : memref<36x256xbf16, #tpu.memory_space<vmem>>, vector<4x256xbf16>,
      %c0_244 = arith.constant 0 : index
      %252 = arith.index_cast %219 : i32 to index
      %c0_245 = arith.constant 0 : index
      %c32 = arith.constant 32 : index
      %253 = vector.load %arg2[%c0_244, %252, %c0_245, %c32] : memref<1x8x4x290xbf16, #tpu.memory_space<vmem>>, vector<1x1x4x256xbf16>
      %254 = vector.shape_cast %253 : vector<1x1x4x256xbf16> to vector<4x256xbf16>
      %255 = vector.broadcast %6 : vector<1x256xbf16> to vector<4x256xbf16>
      %256 = arith.mulf %254, %255 : vector<4x256xbf16>
      %c24 = arith.constant 24 : index
      %c0_246 = arith.constant 0 : index
      %257 = vector.load %arg10[%c24, %c0_246] : memref<36x256xbf16, #tpu.memory_space<vmem>>, vector<4x256xbf16>
      tpu.vector_store %arg10[%c24, %c0_246], %256 {strides = array<i32>} : memref<36x256xbf16, #tpu.memory_space<vmem>>, vector<4x256xbf16>,
      %c0_247 = arith.constant 0 : index
      %258 = arith.index_cast %219 : i32 to index
      %c0_248 = arith.constant 0 : index
      %c33 = arith.constant 33 : index
      %259 = vector.load %arg2[%c0_247, %258, %c0_248, %c33] : memref<1x8x4x290xbf16, #tpu.memory_space<vmem>>, vector<1x1x4x256xbf16>
      %260 = vector.shape_cast %259 : vector<1x1x4x256xbf16> to vector<4x256xbf16>
      %c28 = arith.constant 28 : index
      %c0_249 = arith.constant 0 : index
      %261 = vector.load %arg10[%c28, %c0_249] : memref<36x256xbf16, #tpu.memory_space<vmem>>, vector<4x256xbf16>
      tpu.vector_store %arg10[%c28, %c0_249], %260 {strides = array<i32>} : memref<36x256xbf16, #tpu.memory_space<vmem>>, vector<4x256xbf16>,
      %c0_250 = arith.constant 0 : index
      %262 = arith.index_cast %219 : i32 to index
      %c0_251 = arith.constant 0 : index
      %c34 = arith.constant 34 : index
      %263 = vector.load %arg2[%c0_250, %262, %c0_251, %c34] : memref<1x8x4x290xbf16, #tpu.memory_space<vmem>>, vector<1x1x4x256xbf16>
      %264 = vector.shape_cast %263 : vector<1x1x4x256xbf16> to vector<4x256xbf16>
      %265 = vector.broadcast %7 : vector<1x256xbf16> to vector<4x256xbf16>
      %266 = arith.mulf %264, %265 : vector<4x256xbf16>
      %c32_252 = arith.constant 32 : index
      %c0_253 = arith.constant 0 : index
      %267 = vector.load %arg10[%c32_252, %c0_253] : memref<36x256xbf16, #tpu.memory_space<vmem>>, vector<4x256xbf16>
      tpu.vector_store %arg10[%c32_252, %c0_253], %266 {strides = array<i32>} : memref<36x256xbf16, #tpu.memory_space<vmem>>, vector<4x256xbf16>,
      %c0_254 = arith.constant 0 : index
      %c0_255 = arith.constant 0 : index
      %268 = vector.load %arg10[%c0_254, %c0_255] : memref<36x256xbf16, #tpu.memory_space<vmem>>, vector<36x256xbf16>
      %cst_256 = arith.constant dense<0.000000e+00> : vector<8x256xf32>
      %269 = tpu.matmul %3, %268, %cst_256 {dimension_numbers = #tpu.dot_dimension_numbers<[1], [0], [0], [1], [0, 0, 1, 1], [], []>} : vector<8x36xbf16>, vector<36x256xbf16>, vector<8x256xf32> -> vector<8x256xf32>
      %270 = vector.broadcast %4 : vector<8x1xf32> to vector<8x256xf32>
      %271 = arith.addf %269, %270 : vector<8x256xf32>
      %cst_257 = arith.constant 0.000000e+00 : f32
      %272 = vector.broadcast %cst_257 : f32 to vector<8x256xf32>
      %273 = arith.maximumf %271, %272 : vector<8x256xf32>
      %c0_i32_258 = arith.constant 0 : i32
      %274 = arith.cmpi sge, %217, %c0_i32_258 : i32
      %c8_i32_259 = arith.constant 8 : i32
      %275 = arith.cmpi slt, %217, %c8_i32_259 : i32
      %276 = arith.andi %274, %275 : i1
      %277 = arith.extui %276 : i1 to i32
      %278 = arith.sitofp %277 : i32 to f32
      %279 = vector.broadcast %278 : f32 to vector<8x256xf32>
      %280 = arith.mulf %273, %279 : vector<8x256xf32>
      %281 = arith.truncf %280 : vector<8x256xf32> to vector<8x256xbf16>
      %282 = arith.index_cast %arg12 : i32 to index
      %c0_260 = arith.constant 0 : index
      %c0_261 = arith.constant 0 : index
      %283 = vector.load %arg11[%282, %c0_260, %c0_261] : memref<10x8x256xbf16, #tpu.memory_space<vmem>>, vector<1x8x256xbf16>
      %284 = vector.shape_cast %283 : vector<1x8x256xbf16> to vector<8x256xbf16>
      %285 = vector.shape_cast %281 : vector<8x256xbf16> to vector<1x8x256xbf16>
      tpu.vector_store %arg11[%282, %c0_260, %c0_261], %285 {strides = array<i32>} : memref<10x8x256xbf16, #tpu.memory_space<vmem>>, vector<1x8x256xbf16>,
    }
    %c10_i32_11 = arith.constant 10 : i32
    %cst = arith.constant 0.000000e+00 : f32
    %9 = vector.broadcast %cst : f32 to vector<8x256xf32>
    %c0_12 = arith.constant 0 : index
    %c0_13 = arith.constant 0 : index
    %c0_14 = arith.constant 0 : index
    %10 = vector.load %arg4[%c0_12, %c0_13, %c0_14] : memref<3x8x8xbf16, #tpu.memory_space<vmem>>, vector<1x8x8xbf16>
    %11 = vector.shape_cast %10 : vector<1x8x8xbf16> to vector<8x8xbf16>
    %c0_15 = arith.constant 0 : index
    %c0_16 = arith.constant 0 : index
    %c0_17 = arith.constant 0 : index
    %12 = vector.load %arg11[%c0_15, %c0_16, %c0_17] : memref<10x8x256xbf16, #tpu.memory_space<vmem>>, vector<1x8x256xbf16>
    %13 = vector.shape_cast %12 : vector<1x8x256xbf16> to vector<8x256xbf16>
    %cst_18 = arith.constant dense<0.000000e+00> : vector<8x256xf32>
    %14 = tpu.matmul %11, %13, %cst_18 {dimension_numbers = #tpu.dot_dimension_numbers<[1], [0], [0], [1], [0, 0, 1, 1], [], []>} : vector<8x8xbf16>, vector<8x256xbf16>, vector<8x256xf32> -> vector<8x256xf32>
    %15 = arith.addf %9, %14 : vector<8x256xf32>
    %c1 = arith.constant 1 : index
    %c0_19 = arith.constant 0 : index
    %c0_20 = arith.constant 0 : index
    %16 = vector.load %arg4[%c1, %c0_19, %c0_20] : memref<3x8x8xbf16, #tpu.memory_space<vmem>>, vector<1x8x8xbf16>
    %17 = vector.shape_cast %16 : vector<1x8x8xbf16> to vector<8x8xbf16>
    %c1_21 = arith.constant 1 : index
    %c0_22 = arith.constant 0 : index
    %c0_23 = arith.constant 0 : index
    %18 = vector.load %arg11[%c1_21, %c0_22, %c0_23] : memref<10x8x256xbf16, #tpu.memory_space<vmem>>, vector<1x8x256xbf16>
    %19 = vector.shape_cast %18 : vector<1x8x256xbf16> to vector<8x256xbf16>
    %cst_24 = arith.constant dense<0.000000e+00> : vector<8x256xf32>
    %20 = tpu.matmul %17, %19, %cst_24 {dimension_numbers = #tpu.dot_dimension_numbers<[1], [0], [0], [1], [0, 0, 1, 1], [], []>} : vector<8x8xbf16>, vector<8x256xbf16>, vector<8x256xf32> -> vector<8x256xf32>
    %21 = arith.addf %15, %20 : vector<8x256xf32>
    %c2 = arith.constant 2 : index
    %c0_25 = arith.constant 0 : index
    %c0_26 = arith.constant 0 : index
    %22 = vector.load %arg4[%c2, %c0_25, %c0_26] : memref<3x8x8xbf16, #tpu.memory_space<vmem>>, vector<1x8x8xbf16>
    %23 = vector.shape_cast %22 : vector<1x8x8xbf16> to vector<8x8xbf16>
    %c2_27 = arith.constant 2 : index
    %c0_28 = arith.constant 0 : index
    %c0_29 = arith.constant 0 : index
    %24 = vector.load %arg11[%c2_27, %c0_28, %c0_29] : memref<10x8x256xbf16, #tpu.memory_space<vmem>>, vector<1x8x256xbf16>
    %25 = vector.shape_cast %24 : vector<1x8x256xbf16> to vector<8x256xbf16>
    %cst_30 = arith.constant dense<0.000000e+00> : vector<8x256xf32>
    %26 = tpu.matmul %23, %25, %cst_30 {dimension_numbers = #tpu.dot_dimension_numbers<[1], [0], [0], [1], [0, 0, 1, 1], [], []>} : vector<8x8xbf16>, vector<8x256xbf16>, vector<8x256xf32> -> vector<8x256xf32>
    %27 = arith.addf %21, %26 : vector<8x256xf32>
    %28 = vector.broadcast %5 : vector<8x1xf32> to vector<8x256xf32>
    %29 = arith.addf %27, %28 : vector<8x256xf32>
    %cst_31 = arith.constant 0.000000e+00 : f32
    %30 = vector.broadcast %cst_31 : f32 to vector<8x256xf32>
    %31 = arith.maximumf %29, %30 : vector<8x256xf32>
    %c0_32 = arith.constant 0 : index
    %c0_33 = arith.constant 0 : index
    %c0_34 = arith.constant 0 : index
    %c0_35 = arith.constant 0 : index
    %32 = vector.load %arg9[%c0_32, %c0_33, %c0_34, %c0_35] : memref<1x8x8x256xf32, #tpu.memory_space<vmem>>, vector<1x8x1x256xf32>
    %33 = vector.shape_cast %32 : vector<1x8x1x256xf32> to vector<8x256xf32>
    %34 = vector.shape_cast %31 : vector<8x256xf32> to vector<1x8x1x256xf32>
    tpu.vector_store %arg9[%c0_32, %c0_33, %c0_34, %c0_35], %34 {strides = array<i32>} : memref<1x8x8x256xf32, #tpu.memory_space<vmem>>, vector<1x8x1x256xf32>,
    %cst_36 = arith.constant 0.000000e+00 : f32
    %35 = vector.broadcast %cst_36 : f32 to vector<8x256xf32>
    %c0_37 = arith.constant 0 : index
    %c0_38 = arith.constant 0 : index
    %c0_39 = arith.constant 0 : index
    %36 = vector.load %arg4[%c0_37, %c0_38, %c0_39] : memref<3x8x8xbf16, #tpu.memory_space<vmem>>, vector<1x8x8xbf16>
    %37 = vector.shape_cast %36 : vector<1x8x8xbf16> to vector<8x8xbf16>
    %c1_40 = arith.constant 1 : index
    %c0_41 = arith.constant 0 : index
    %c0_42 = arith.constant 0 : index
    %38 = vector.load %arg11[%c1_40, %c0_41, %c0_42] : memref<10x8x256xbf16, #tpu.memory_space<vmem>>, vector<1x8x256xbf16>
    %39 = vector.shape_cast %38 : vector<1x8x256xbf16> to vector<8x256xbf16>
    %cst_43 = arith.constant dense<0.000000e+00> : vector<8x256xf32>
    %40 = tpu.matmul %37, %39, %cst_43 {dimension_numbers = #tpu.dot_dimension_numbers<[1], [0], [0], [1], [0, 0, 1, 1], [], []>} : vector<8x8xbf16>, vector<8x256xbf16>, vector<8x256xf32> -> vector<8x256xf32>
    %41 = arith.addf %35, %40 : vector<8x256xf32>
    %c1_44 = arith.constant 1 : index
    %c0_45 = arith.constant 0 : index
    %c0_46 = arith.constant 0 : index
    %42 = vector.load %arg4[%c1_44, %c0_45, %c0_46] : memref<3x8x8xbf16, #tpu.memory_space<vmem>>, vector<1x8x8xbf16>
    %43 = vector.shape_cast %42 : vector<1x8x8xbf16> to vector<8x8xbf16>
    %c2_47 = arith.constant 2 : index
    %c0_48 = arith.constant 0 : index
    %c0_49 = arith.constant 0 : index
    %44 = vector.load %arg11[%c2_47, %c0_48, %c0_49] : memref<10x8x256xbf16, #tpu.memory_space<vmem>>, vector<1x8x256xbf16>
    %45 = vector.shape_cast %44 : vector<1x8x256xbf16> to vector<8x256xbf16>
    %cst_50 = arith.constant dense<0.000000e+00> : vector<8x256xf32>
    %46 = tpu.matmul %43, %45, %cst_50 {dimension_numbers = #tpu.dot_dimension_numbers<[1], [0], [0], [1], [0, 0, 1, 1], [], []>} : vector<8x8xbf16>, vector<8x256xbf16>, vector<8x256xf32> -> vector<8x256xf32>
    %47 = arith.addf %41, %46 : vector<8x256xf32>
    %c2_51 = arith.constant 2 : index
    %c0_52 = arith.constant 0 : index
    %c0_53 = arith.constant 0 : index
    %48 = vector.load %arg4[%c2_51, %c0_52, %c0_53] : memref<3x8x8xbf16, #tpu.memory_space<vmem>>, vector<1x8x8xbf16>
    %49 = vector.shape_cast %48 : vector<1x8x8xbf16> to vector<8x8xbf16>
    %c3 = arith.constant 3 : index
    %c0_54 = arith.constant 0 : index
    %c0_55 = arith.constant 0 : index
    %50 = vector.load %arg11[%c3, %c0_54, %c0_55] : memref<10x8x256xbf16, #tpu.memory_space<vmem>>, vector<1x8x256xbf16>
    %51 = vector.shape_cast %50 : vector<1x8x256xbf16> to vector<8x256xbf16>
    %cst_56 = arith.constant dense<0.000000e+00> : vector<8x256xf32>
    %52 = tpu.matmul %49, %51, %cst_56 {dimension_numbers = #tpu.dot_dimension_numbers<[1], [0], [0], [1], [0, 0, 1, 1], [], []>} : vector<8x8xbf16>, vector<8x256xbf16>, vector<8x256xf32> -> vector<8x256xf32>
    %53 = arith.addf %47, %52 : vector<8x256xf32>
    %54 = vector.broadcast %5 : vector<8x1xf32> to vector<8x256xf32>
    %55 = arith.addf %53, %54 : vector<8x256xf32>
    %cst_57 = arith.constant 0.000000e+00 : f32
    %56 = vector.broadcast %cst_57 : f32 to vector<8x256xf32>
    %57 = arith.maximumf %55, %56 : vector<8x256xf32>
    %c0_58 = arith.constant 0 : index
    %c0_59 = arith.constant 0 : index
    %c1_60 = arith.constant 1 : index
    %c0_61 = arith.constant 0 : index
    %58 = vector.load %arg9[%c0_58, %c0_59, %c1_60, %c0_61] : memref<1x8x8x256xf32, #tpu.memory_space<vmem>>, vector<1x8x1x256xf32>
    %59 = vector.shape_cast %58 : vector<1x8x1x256xf32> to vector<8x256xf32>
    %60 = vector.shape_cast %57 : vector<8x256xf32> to vector<1x8x1x256xf32>
    tpu.vector_store %arg9[%c0_58, %c0_59, %c1_60, %c0_61], %60 {strides = array<i32>} : memref<1x8x8x256xf32, #tpu.memory_space<vmem>>, vector<1x8x1x256xf32>,
    %cst_62 = arith.constant 0.000000e+00 : f32
    %61 = vector.broadcast %cst_62 : f32 to vector<8x256xf32>
    %c0_63 = arith.constant 0 : index
    %c0_64 = arith.constant 0 : index
    %c0_65 = arith.constant 0 : index
    %62 = vector.load %arg4[%c0_63, %c0_64, %c0_65] : memref<3x8x8xbf16, #tpu.memory_space<vmem>>, vector<1x8x8xbf16>
    %63 = vector.shape_cast %62 : vector<1x8x8xbf16> to vector<8x8xbf16>
    %c2_66 = arith.constant 2 : index
    %c0_67 = arith.constant 0 : index
    %c0_68 = arith.constant 0 : index
    %64 = vector.load %arg11[%c2_66, %c0_67, %c0_68] : memref<10x8x256xbf16, #tpu.memory_space<vmem>>, vector<1x8x256xbf16>
    %65 = vector.shape_cast %64 : vector<1x8x256xbf16> to vector<8x256xbf16>
    %cst_69 = arith.constant dense<0.000000e+00> : vector<8x256xf32>
    %66 = tpu.matmul %63, %65, %cst_69 {dimension_numbers = #tpu.dot_dimension_numbers<[1], [0], [0], [1], [0, 0, 1, 1], [], []>} : vector<8x8xbf16>, vector<8x256xbf16>, vector<8x256xf32> -> vector<8x256xf32>
    %67 = arith.addf %61, %66 : vector<8x256xf32>
    %c1_70 = arith.constant 1 : index
    %c0_71 = arith.constant 0 : index
    %c0_72 = arith.constant 0 : index
    %68 = vector.load %arg4[%c1_70, %c0_71, %c0_72] : memref<3x8x8xbf16, #tpu.memory_space<vmem>>, vector<1x8x8xbf16>
    %69 = vector.shape_cast %68 : vector<1x8x8xbf16> to vector<8x8xbf16>
    %c3_73 = arith.constant 3 : index
    %c0_74 = arith.constant 0 : index
    %c0_75 = arith.constant 0 : index
    %70 = vector.load %arg11[%c3_73, %c0_74, %c0_75] : memref<10x8x256xbf16, #tpu.memory_space<vmem>>, vector<1x8x256xbf16>
    %71 = vector.shape_cast %70 : vector<1x8x256xbf16> to vector<8x256xbf16>
    %cst_76 = arith.constant dense<0.000000e+00> : vector<8x256xf32>
    %72 = tpu.matmul %69, %71, %cst_76 {dimension_numbers = #tpu.dot_dimension_numbers<[1], [0], [0], [1], [0, 0, 1, 1], [], []>} : vector<8x8xbf16>, vector<8x256xbf16>, vector<8x256xf32> -> vector<8x256xf32>
    %73 = arith.addf %67, %72 : vector<8x256xf32>
    %c2_77 = arith.constant 2 : index
    %c0_78 = arith.constant 0 : index
    %c0_79 = arith.constant 0 : index
    %74 = vector.load %arg4[%c2_77, %c0_78, %c0_79] : memref<3x8x8xbf16, #tpu.memory_space<vmem>>, vector<1x8x8xbf16>
    %75 = vector.shape_cast %74 : vector<1x8x8xbf16> to vector<8x8xbf16>
    %c4 = arith.constant 4 : index
    %c0_80 = arith.constant 0 : index
    %c0_81 = arith.constant 0 : index
    %76 = vector.load %arg11[%c4, %c0_80, %c0_81] : memref<10x8x256xbf16, #tpu.memory_space<vmem>>, vector<1x8x256xbf16>
    %77 = vector.shape_cast %76 : vector<1x8x256xbf16> to vector<8x256xbf16>
    %cst_82 = arith.constant dense<0.000000e+00> : vector<8x256xf32>
    %78 = tpu.matmul %75, %77, %cst_82 {dimension_numbers = #tpu.dot_dimension_numbers<[1], [0], [0], [1], [0, 0, 1, 1], [], []>} : vector<8x8xbf16>, vector<8x256xbf16>, vector<8x256xf32> -> vector<8x256xf32>
    %79 = arith.addf %73, %78 : vector<8x256xf32>
    %80 = vector.broadcast %5 : vector<8x1xf32> to vector<8x256xf32>
    %81 = arith.addf %79, %80 : vector<8x256xf32>
    %cst_83 = arith.constant 0.000000e+00 : f32
    %82 = vector.broadcast %cst_83 : f32 to vector<8x256xf32>
    %83 = arith.maximumf %81, %82 : vector<8x256xf32>
    %c0_84 = arith.constant 0 : index
    %c0_85 = arith.constant 0 : index
    %c2_86 = arith.constant 2 : index
    %c0_87 = arith.constant 0 : index
    %84 = vector.load %arg9[%c0_84, %c0_85, %c2_86, %c0_87] : memref<1x8x8x256xf32, #tpu.memory_space<vmem>>, vector<1x8x1x256xf32>
    %85 = vector.shape_cast %84 : vector<1x8x1x256xf32> to vector<8x256xf32>
    %86 = vector.shape_cast %83 : vector<8x256xf32> to vector<1x8x1x256xf32>
    tpu.vector_store %arg9[%c0_84, %c0_85, %c2_86, %c0_87], %86 {strides = array<i32>} : memref<1x8x8x256xf32, #tpu.memory_space<vmem>>, vector<1x8x1x256xf32>,
    %cst_88 = arith.constant 0.000000e+00 : f32
    %87 = vector.broadcast %cst_88 : f32 to vector<8x256xf32>
    %c0_89 = arith.constant 0 : index
    %c0_90 = arith.constant 0 : index
    %c0_91 = arith.constant 0 : index
    %88 = vector.load %arg4[%c0_89, %c0_90, %c0_91] : memref<3x8x8xbf16, #tpu.memory_space<vmem>>, vector<1x8x8xbf16>
    %89 = vector.shape_cast %88 : vector<1x8x8xbf16> to vector<8x8xbf16>
    %c3_92 = arith.constant 3 : index
    %c0_93 = arith.constant 0 : index
    %c0_94 = arith.constant 0 : index
    %90 = vector.load %arg11[%c3_92, %c0_93, %c0_94] : memref<10x8x256xbf16, #tpu.memory_space<vmem>>, vector<1x8x256xbf16>
    %91 = vector.shape_cast %90 : vector<1x8x256xbf16> to vector<8x256xbf16>
    %cst_95 = arith.constant dense<0.000000e+00> : vector<8x256xf32>
    %92 = tpu.matmul %89, %91, %cst_95 {dimension_numbers = #tpu.dot_dimension_numbers<[1], [0], [0], [1], [0, 0, 1, 1], [], []>} : vector<8x8xbf16>, vector<8x256xbf16>, vector<8x256xf32> -> vector<8x256xf32>
    %93 = arith.addf %87, %92 : vector<8x256xf32>
    %c1_96 = arith.constant 1 : index
    %c0_97 = arith.constant 0 : index
    %c0_98 = arith.constant 0 : index
    %94 = vector.load %arg4[%c1_96, %c0_97, %c0_98] : memref<3x8x8xbf16, #tpu.memory_space<vmem>>, vector<1x8x8xbf16>
    %95 = vector.shape_cast %94 : vector<1x8x8xbf16> to vector<8x8xbf16>
    %c4_99 = arith.constant 4 : index
    %c0_100 = arith.constant 0 : index
    %c0_101 = arith.constant 0 : index
    %96 = vector.load %arg11[%c4_99, %c0_100, %c0_101] : memref<10x8x256xbf16, #tpu.memory_space<vmem>>, vector<1x8x256xbf16>
    %97 = vector.shape_cast %96 : vector<1x8x256xbf16> to vector<8x256xbf16>
    %cst_102 = arith.constant dense<0.000000e+00> : vector<8x256xf32>
    %98 = tpu.matmul %95, %97, %cst_102 {dimension_numbers = #tpu.dot_dimension_numbers<[1], [0], [0], [1], [0, 0, 1, 1], [], []>} : vector<8x8xbf16>, vector<8x256xbf16>, vector<8x256xf32> -> vector<8x256xf32>
    %99 = arith.addf %93, %98 : vector<8x256xf32>
    %c2_103 = arith.constant 2 : index
    %c0_104 = arith.constant 0 : index
    %c0_105 = arith.constant 0 : index
    %100 = vector.load %arg4[%c2_103, %c0_104, %c0_105] : memref<3x8x8xbf16, #tpu.memory_space<vmem>>, vector<1x8x8xbf16>
    %101 = vector.shape_cast %100 : vector<1x8x8xbf16> to vector<8x8xbf16>
    %c5 = arith.constant 5 : index
    %c0_106 = arith.constant 0 : index
    %c0_107 = arith.constant 0 : index
    %102 = vector.load %arg11[%c5, %c0_106, %c0_107] : memref<10x8x256xbf16, #tpu.memory_space<vmem>>, vector<1x8x256xbf16>
    %103 = vector.shape_cast %102 : vector<1x8x256xbf16> to vector<8x256xbf16>
    %cst_108 = arith.constant dense<0.000000e+00> : vector<8x256xf32>
    %104 = tpu.matmul %101, %103, %cst_108 {dimension_numbers = #tpu.dot_dimension_numbers<[1], [0], [0], [1], [0, 0, 1, 1], [], []>} : vector<8x8xbf16>, vector<8x256xbf16>, vector<8x256xf32> -> vector<8x256xf32>
    %105 = arith.addf %99, %104 : vector<8x256xf32>
    %106 = vector.broadcast %5 : vector<8x1xf32> to vector<8x256xf32>
    %107 = arith.addf %105, %106 : vector<8x256xf32>
    %cst_109 = arith.constant 0.000000e+00 : f32
    %108 = vector.broadcast %cst_109 : f32 to vector<8x256xf32>
    %109 = arith.maximumf %107, %108 : vector<8x256xf32>
    %c0_110 = arith.constant 0 : index
    %c0_111 = arith.constant 0 : index
    %c3_112 = arith.constant 3 : index
    %c0_113 = arith.constant 0 : index
    %110 = vector.load %arg9[%c0_110, %c0_111, %c3_112, %c0_113] : memref<1x8x8x256xf32, #tpu.memory_space<vmem>>, vector<1x8x1x256xf32>
    %111 = vector.shape_cast %110 : vector<1x8x1x256xf32> to vector<8x256xf32>
    %112 = vector.shape_cast %109 : vector<8x256xf32> to vector<1x8x1x256xf32>
    tpu.vector_store %arg9[%c0_110, %c0_111, %c3_112, %c0_113], %112 {strides = array<i32>} : memref<1x8x8x256xf32, #tpu.memory_space<vmem>>, vector<1x8x1x256xf32>,
    %cst_114 = arith.constant 0.000000e+00 : f32
    %113 = vector.broadcast %cst_114 : f32 to vector<8x256xf32>
    %c0_115 = arith.constant 0 : index
    %c0_116 = arith.constant 0 : index
    %c0_117 = arith.constant 0 : index
    %114 = vector.load %arg4[%c0_115, %c0_116, %c0_117] : memref<3x8x8xbf16, #tpu.memory_space<vmem>>, vector<1x8x8xbf16>
    %115 = vector.shape_cast %114 : vector<1x8x8xbf16> to vector<8x8xbf16>
    %c4_118 = arith.constant 4 : index
    %c0_119 = arith.constant 0 : index
    %c0_120 = arith.constant 0 : index
    %116 = vector.load %arg11[%c4_118, %c0_119, %c0_120] : memref<10x8x256xbf16, #tpu.memory_space<vmem>>, vector<1x8x256xbf16>
    %117 = vector.shape_cast %116 : vector<1x8x256xbf16> to vector<8x256xbf16>
    %cst_121 = arith.constant dense<0.000000e+00> : vector<8x256xf32>
    %118 = tpu.matmul %115, %117, %cst_121 {dimension_numbers = #tpu.dot_dimension_numbers<[1], [0], [0], [1], [0, 0, 1, 1], [], []>} : vector<8x8xbf16>, vector<8x256xbf16>, vector<8x256xf32> -> vector<8x256xf32>
    %119 = arith.addf %113, %118 : vector<8x256xf32>
    %c1_122 = arith.constant 1 : index
    %c0_123 = arith.constant 0 : index
    %c0_124 = arith.constant 0 : index
    %120 = vector.load %arg4[%c1_122, %c0_123, %c0_124] : memref<3x8x8xbf16, #tpu.memory_space<vmem>>, vector<1x8x8xbf16>
    %121 = vector.shape_cast %120 : vector<1x8x8xbf16> to vector<8x8xbf16>
    %c5_125 = arith.constant 5 : index
    %c0_126 = arith.constant 0 : index
    %c0_127 = arith.constant 0 : index
    %122 = vector.load %arg11[%c5_125, %c0_126, %c0_127] : memref<10x8x256xbf16, #tpu.memory_space<vmem>>, vector<1x8x256xbf16>
    %123 = vector.shape_cast %122 : vector<1x8x256xbf16> to vector<8x256xbf16>
    %cst_128 = arith.constant dense<0.000000e+00> : vector<8x256xf32>
    %124 = tpu.matmul %121, %123, %cst_128 {dimension_numbers = #tpu.dot_dimension_numbers<[1], [0], [0], [1], [0, 0, 1, 1], [], []>} : vector<8x8xbf16>, vector<8x256xbf16>, vector<8x256xf32> -> vector<8x256xf32>
    %125 = arith.addf %119, %124 : vector<8x256xf32>
    %c2_129 = arith.constant 2 : index
    %c0_130 = arith.constant 0 : index
    %c0_131 = arith.constant 0 : index
    %126 = vector.load %arg4[%c2_129, %c0_130, %c0_131] : memref<3x8x8xbf16, #tpu.memory_space<vmem>>, vector<1x8x8xbf16>
    %127 = vector.shape_cast %126 : vector<1x8x8xbf16> to vector<8x8xbf16>
    %c6 = arith.constant 6 : index
    %c0_132 = arith.constant 0 : index
    %c0_133 = arith.constant 0 : index
    %128 = vector.load %arg11[%c6, %c0_132, %c0_133] : memref<10x8x256xbf16, #tpu.memory_space<vmem>>, vector<1x8x256xbf16>
    %129 = vector.shape_cast %128 : vector<1x8x256xbf16> to vector<8x256xbf16>
    %cst_134 = arith.constant dense<0.000000e+00> : vector<8x256xf32>
    %130 = tpu.matmul %127, %129, %cst_134 {dimension_numbers = #tpu.dot_dimension_numbers<[1], [0], [0], [1], [0, 0, 1, 1], [], []>} : vector<8x8xbf16>, vector<8x256xbf16>, vector<8x256xf32> -> vector<8x256xf32>
    %131 = arith.addf %125, %130 : vector<8x256xf32>
    %132 = vector.broadcast %5 : vector<8x1xf32> to vector<8x256xf32>
    %133 = arith.addf %131, %132 : vector<8x256xf32>
    %cst_135 = arith.constant 0.000000e+00 : f32
    %134 = vector.broadcast %cst_135 : f32 to vector<8x256xf32>
    %135 = arith.maximumf %133, %134 : vector<8x256xf32>
    %c0_136 = arith.constant 0 : index
    %c0_137 = arith.constant 0 : index
    %c4_138 = arith.constant 4 : index
    %c0_139 = arith.constant 0 : index
    %136 = vector.load %arg9[%c0_136, %c0_137, %c4_138, %c0_139] : memref<1x8x8x256xf32, #tpu.memory_space<vmem>>, vector<1x8x1x256xf32>
    %137 = vector.shape_cast %136 : vector<1x8x1x256xf32> to vector<8x256xf32>
    %138 = vector.shape_cast %135 : vector<8x256xf32> to vector<1x8x1x256xf32>
    tpu.vector_store %arg9[%c0_136, %c0_137, %c4_138, %c0_139], %138 {strides = array<i32>} : memref<1x8x8x256xf32, #tpu.memory_space<vmem>>, vector<1x8x1x256xf32>,
    %cst_140 = arith.constant 0.000000e+00 : f32
    %139 = vector.broadcast %cst_140 : f32 to vector<8x256xf32>
    %c0_141 = arith.constant 0 : index
    %c0_142 = arith.constant 0 : index
    %c0_143 = arith.constant 0 : index
    %140 = vector.load %arg4[%c0_141, %c0_142, %c0_143] : memref<3x8x8xbf16, #tpu.memory_space<vmem>>, vector<1x8x8xbf16>
    %141 = vector.shape_cast %140 : vector<1x8x8xbf16> to vector<8x8xbf16>
    %c5_144 = arith.constant 5 : index
    %c0_145 = arith.constant 0 : index
    %c0_146 = arith.constant 0 : index
    %142 = vector.load %arg11[%c5_144, %c0_145, %c0_146] : memref<10x8x256xbf16, #tpu.memory_space<vmem>>, vector<1x8x256xbf16>
    %143 = vector.shape_cast %142 : vector<1x8x256xbf16> to vector<8x256xbf16>
    %cst_147 = arith.constant dense<0.000000e+00> : vector<8x256xf32>
    %144 = tpu.matmul %141, %143, %cst_147 {dimension_numbers = #tpu.dot_dimension_numbers<[1], [0], [0], [1], [0, 0, 1, 1], [], []>} : vector<8x8xbf16>, vector<8x256xbf16>, vector<8x256xf32> -> vector<8x256xf32>
    %145 = arith.addf %139, %144 : vector<8x256xf32>
    %c1_148 = arith.constant 1 : index
    %c0_149 = arith.constant 0 : index
    %c0_150 = arith.constant 0 : index
    %146 = vector.load %arg4[%c1_148, %c0_149, %c0_150] : memref<3x8x8xbf16, #tpu.memory_space<vmem>>, vector<1x8x8xbf16>
    %147 = vector.shape_cast %146 : vector<1x8x8xbf16> to vector<8x8xbf16>
    %c6_151 = arith.constant 6 : index
    %c0_152 = arith.constant 0 : index
    %c0_153 = arith.constant 0 : index
    %148 = vector.load %arg11[%c6_151, %c0_152, %c0_153] : memref<10x8x256xbf16, #tpu.memory_space<vmem>>, vector<1x8x256xbf16>
    %149 = vector.shape_cast %148 : vector<1x8x256xbf16> to vector<8x256xbf16>
    %cst_154 = arith.constant dense<0.000000e+00> : vector<8x256xf32>
    %150 = tpu.matmul %147, %149, %cst_154 {dimension_numbers = #tpu.dot_dimension_numbers<[1], [0], [0], [1], [0, 0, 1, 1], [], []>} : vector<8x8xbf16>, vector<8x256xbf16>, vector<8x256xf32> -> vector<8x256xf32>
    %151 = arith.addf %145, %150 : vector<8x256xf32>
    %c2_155 = arith.constant 2 : index
    %c0_156 = arith.constant 0 : index
    %c0_157 = arith.constant 0 : index
    %152 = vector.load %arg4[%c2_155, %c0_156, %c0_157] : memref<3x8x8xbf16, #tpu.memory_space<vmem>>, vector<1x8x8xbf16>
    %153 = vector.shape_cast %152 : vector<1x8x8xbf16> to vector<8x8xbf16>
    %c7 = arith.constant 7 : index
    %c0_158 = arith.constant 0 : index
    %c0_159 = arith.constant 0 : index
    %154 = vector.load %arg11[%c7, %c0_158, %c0_159] : memref<10x8x256xbf16, #tpu.memory_space<vmem>>, vector<1x8x256xbf16>
    %155 = vector.shape_cast %154 : vector<1x8x256xbf16> to vector<8x256xbf16>
    %cst_160 = arith.constant dense<0.000000e+00> : vector<8x256xf32>
    %156 = tpu.matmul %153, %155, %cst_160 {dimension_numbers = #tpu.dot_dimension_numbers<[1], [0], [0], [1], [0, 0, 1, 1], [], []>} : vector<8x8xbf16>, vector<8x256xbf16>, vector<8x256xf32> -> vector<8x256xf32>
    %157 = arith.addf %151, %156 : vector<8x256xf32>
    %158 = vector.broadcast %5 : vector<8x1xf32> to vector<8x256xf32>
    %159 = arith.addf %157, %158 : vector<8x256xf32>
    %cst_161 = arith.constant 0.000000e+00 : f32
    %160 = vector.broadcast %cst_161 : f32 to vector<8x256xf32>
    %161 = arith.maximumf %159, %160 : vector<8x256xf32>
    %c0_162 = arith.constant 0 : index
    %c0_163 = arith.constant 0 : index
    %c5_164 = arith.constant 5 : index
    %c0_165 = arith.constant 0 : index
    %162 = vector.load %arg9[%c0_162, %c0_163, %c5_164, %c0_165] : memref<1x8x8x256xf32, #tpu.memory_space<vmem>>, vector<1x8x1x256xf32>
    %163 = vector.shape_cast %162 : vector<1x8x1x256xf32> to vector<8x256xf32>
    %164 = vector.shape_cast %161 : vector<8x256xf32> to vector<1x8x1x256xf32>
    tpu.vector_store %arg9[%c0_162, %c0_163, %c5_164, %c0_165], %164 {strides = array<i32>} : memref<1x8x8x256xf32, #tpu.memory_space<vmem>>, vector<1x8x1x256xf32>,
    %cst_166 = arith.constant 0.000000e+00 : f32
    %165 = vector.broadcast %cst_166 : f32 to vector<8x256xf32>
    %c0_167 = arith.constant 0 : index
    %c0_168 = arith.constant 0 : index
    %c0_169 = arith.constant 0 : index
    %166 = vector.load %arg4[%c0_167, %c0_168, %c0_169] : memref<3x8x8xbf16, #tpu.memory_space<vmem>>, vector<1x8x8xbf16>
    %167 = vector.shape_cast %166 : vector<1x8x8xbf16> to vector<8x8xbf16>
    %c6_170 = arith.constant 6 : index
    %c0_171 = arith.constant 0 : index
    %c0_172 = arith.constant 0 : index
    %168 = vector.load %arg11[%c6_170, %c0_171, %c0_172] : memref<10x8x256xbf16, #tpu.memory_space<vmem>>, vector<1x8x256xbf16>
    %169 = vector.shape_cast %168 : vector<1x8x256xbf16> to vector<8x256xbf16>
    %cst_173 = arith.constant dense<0.000000e+00> : vector<8x256xf32>
    %170 = tpu.matmul %167, %169, %cst_173 {dimension_numbers = #tpu.dot_dimension_numbers<[1], [0], [0], [1], [0, 0, 1, 1], [], []>} : vector<8x8xbf16>, vector<8x256xbf16>, vector<8x256xf32> -> vector<8x256xf32>
    %171 = arith.addf %165, %170 : vector<8x256xf32>
    %c1_174 = arith.constant 1 : index
    %c0_175 = arith.constant 0 : index
    %c0_176 = arith.constant 0 : index
    %172 = vector.load %arg4[%c1_174, %c0_175, %c0_176] : memref<3x8x8xbf16, #tpu.memory_space<vmem>>, vector<1x8x8xbf16>
    %173 = vector.shape_cast %172 : vector<1x8x8xbf16> to vector<8x8xbf16>
    %c7_177 = arith.constant 7 : index
    %c0_178 = arith.constant 0 : index
    %c0_179 = arith.constant 0 : index
    %174 = vector.load %arg11[%c7_177, %c0_178, %c0_179] : memref<10x8x256xbf16, #tpu.memory_space<vmem>>, vector<1x8x256xbf16>
    %175 = vector.shape_cast %174 : vector<1x8x256xbf16> to vector<8x256xbf16>
    %cst_180 = arith.constant dense<0.000000e+00> : vector<8x256xf32>
    %176 = tpu.matmul %173, %175, %cst_180 {dimension_numbers = #tpu.dot_dimension_numbers<[1], [0], [0], [1], [0, 0, 1, 1], [], []>} : vector<8x8xbf16>, vector<8x256xbf16>, vector<8x256xf32> -> vector<8x256xf32>
    %177 = arith.addf %171, %176 : vector<8x256xf32>
    %c2_181 = arith.constant 2 : index
    %c0_182 = arith.constant 0 : index
    %c0_183 = arith.constant 0 : index
    %178 = vector.load %arg4[%c2_181, %c0_182, %c0_183] : memref<3x8x8xbf16, #tpu.memory_space<vmem>>, vector<1x8x8xbf16>
    %179 = vector.shape_cast %178 : vector<1x8x8xbf16> to vector<8x8xbf16>
    %c8 = arith.constant 8 : index
    %c0_184 = arith.constant 0 : index
    %c0_185 = arith.constant 0 : index
    %180 = vector.load %arg11[%c8, %c0_184, %c0_185] : memref<10x8x256xbf16, #tpu.memory_space<vmem>>, vector<1x8x256xbf16>
    %181 = vector.shape_cast %180 : vector<1x8x256xbf16> to vector<8x256xbf16>
    %cst_186 = arith.constant dense<0.000000e+00> : vector<8x256xf32>
    %182 = tpu.matmul %179, %181, %cst_186 {dimension_numbers = #tpu.dot_dimension_numbers<[1], [0], [0], [1], [0, 0, 1, 1], [], []>} : vector<8x8xbf16>, vector<8x256xbf16>, vector<8x256xf32> -> vector<8x256xf32>
    %183 = arith.addf %177, %182 : vector<8x256xf32>
    %184 = vector.broadcast %5 : vector<8x1xf32> to vector<8x256xf32>
    %185 = arith.addf %183, %184 : vector<8x256xf32>
    %cst_187 = arith.constant 0.000000e+00 : f32
    %186 = vector.broadcast %cst_187 : f32 to vector<8x256xf32>
    %187 = arith.maximumf %185, %186 : vector<8x256xf32>
    %c0_188 = arith.constant 0 : index
    %c0_189 = arith.constant 0 : index
    %c6_190 = arith.constant 6 : index
    %c0_191 = arith.constant 0 : index
    %188 = vector.load %arg9[%c0_188, %c0_189, %c6_190, %c0_191] : memref<1x8x8x256xf32, #tpu.memory_space<vmem>>, vector<1x8x1x256xf32>
    %189 = vector.shape_cast %188 : vector<1x8x1x256xf32> to vector<8x256xf32>
    %190 = vector.shape_cast %187 : vector<8x256xf32> to vector<1x8x1x256xf32>
    tpu.vector_store %arg9[%c0_188, %c0_189, %c6_190, %c0_191], %190 {strides = array<i32>} : memref<1x8x8x256xf32, #tpu.memory_space<vmem>>, vector<1x8x1x256xf32>,
    %cst_192 = arith.constant 0.000000e+00 : f32
    %191 = vector.broadcast %cst_192 : f32 to vector<8x256xf32>
    %c0_193 = arith.constant 0 : index
    %c0_194 = arith.constant 0 : index
    %c0_195 = arith.constant 0 : index
    %192 = vector.load %arg4[%c0_193, %c0_194, %c0_195] : memref<3x8x8xbf16, #tpu.memory_space<vmem>>, vector<1x8x8xbf16>
    %193 = vector.shape_cast %192 : vector<1x8x8xbf16> to vector<8x8xbf16>
    %c7_196 = arith.constant 7 : index
    %c0_197 = arith.constant 0 : index
    %c0_198 = arith.constant 0 : index
    %194 = vector.load %arg11[%c7_196, %c0_197, %c0_198] : memref<10x8x256xbf16, #tpu.memory_space<vmem>>, vector<1x8x256xbf16>
    %195 = vector.shape_cast %194 : vector<1x8x256xbf16> to vector<8x256xbf16>
    %cst_199 = arith.constant dense<0.000000e+00> : vector<8x256xf32>
    %196 = tpu.matmul %193, %195, %cst_199 {dimension_numbers = #tpu.dot_dimension_numbers<[1], [0], [0], [1], [0, 0, 1, 1], [], []>} : vector<8x8xbf16>, vector<8x256xbf16>, vector<8x256xf32> -> vector<8x256xf32>
    %197 = arith.addf %191, %196 : vector<8x256xf32>
    %c1_200 = arith.constant 1 : index
    %c0_201 = arith.constant 0 : index
    %c0_202 = arith.constant 0 : index
    %198 = vector.load %arg4[%c1_200, %c0_201, %c0_202] : memref<3x8x8xbf16, #tpu.memory_space<vmem>>, vector<1x8x8xbf16>
    %199 = vector.shape_cast %198 : vector<1x8x8xbf16> to vector<8x8xbf16>
    %c8_203 = arith.constant 8 : index
    %c0_204 = arith.constant 0 : index
    %c0_205 = arith.constant 0 : index
    %200 = vector.load %arg11[%c8_203, %c0_204, %c0_205] : memref<10x8x256xbf16, #tpu.memory_space<vmem>>, vector<1x8x256xbf16>
    %201 = vector.shape_cast %200 : vector<1x8x256xbf16> to vector<8x256xbf16>
    %cst_206 = arith.constant dense<0.000000e+00> : vector<8x256xf32>
    %202 = tpu.matmul %199, %201, %cst_206 {dimension_numbers = #tpu.dot_dimension_numbers<[1], [0], [0], [1], [0, 0, 1, 1], [], []>} : vector<8x8xbf16>, vector<8x256xbf16>, vector<8x256xf32> -> vector<8x256xf32>
    %203 = arith.addf %197, %202 : vector<8x256xf32>
    %c2_207 = arith.constant 2 : index
    %c0_208 = arith.constant 0 : index
    %c0_209 = arith.constant 0 : index
    %204 = vector.load %arg4[%c2_207, %c0_208, %c0_209] : memref<3x8x8xbf16, #tpu.memory_space<vmem>>, vector<1x8x8xbf16>
    %205 = vector.shape_cast %204 : vector<1x8x8xbf16> to vector<8x8xbf16>
    %c9 = arith.constant 9 : index
    %c0_210 = arith.constant 0 : index
    %c0_211 = arith.constant 0 : index
    %206 = vector.load %arg11[%c9, %c0_210, %c0_211] : memref<10x8x256xbf16, #tpu.memory_space<vmem>>, vector<1x8x256xbf16>
    %207 = vector.shape_cast %206 : vector<1x8x256xbf16> to vector<8x256xbf16>
    %cst_212 = arith.constant dense<0.000000e+00> : vector<8x256xf32>
    %208 = tpu.matmul %205, %207, %cst_212 {dimension_numbers = #tpu.dot_dimension_numbers<[1], [0], [0], [1], [0, 0, 1, 1], [], []>} : vector<8x8xbf16>, vector<8x256xbf16>, vector<8x256xf32> -> vector<8x256xf32>
    %209 = arith.addf %203, %208 : vector<8x256xf32>
    %210 = vector.broadcast %5 : vector<8x1xf32> to vector<8x256xf32>
    %211 = arith.addf %209, %210 : vector<8x256xf32>
    %cst_213 = arith.constant 0.000000e+00 : f32
    %212 = vector.broadcast %cst_213 : f32 to vector<8x256xf32>
    %213 = arith.maximumf %211, %212 : vector<8x256xf32>
    %c0_214 = arith.constant 0 : index
    %c0_215 = arith.constant 0 : index
    %c7_216 = arith.constant 7 : index
    %c0_217 = arith.constant 0 : index
    %214 = vector.load %arg9[%c0_214, %c0_215, %c7_216, %c0_217] : memref<1x8x8x256xf32, #tpu.memory_space<vmem>>, vector<1x8x1x256xf32>
    %215 = vector.shape_cast %214 : vector<1x8x1x256xf32> to vector<8x256xf32>
    %216 = vector.shape_cast %213 : vector<8x256xf32> to vector<1x8x1x256xf32>
    tpu.vector_store %arg9[%c0_214, %c0_215, %c7_216, %c0_217], %216 {strides = array<i32>} : memref<1x8x8x256xf32, #tpu.memory_space<vmem>>, vector<1x8x1x256xf32>,
    return
  }
  func.func @transform_0(%arg0: i32, %arg1: i32) -> (i32, i32, i32, i32) {
    %c0_i32 = arith.constant 0 : i32
    %c0_i32_0 = arith.constant 0 : i32
    %c0_i32_1 = arith.constant 0 : i32
    %c0_i32_2 = arith.constant 0 : i32
    return %arg0, %c0_i32, %c0_i32_0, %c0_i32_1 : i32, i32, i32, i32
  }
  func.func @transform_1(%arg0: i32, %arg1: i32) -> (i32, i32) {
    %c0_i32 = arith.constant 0 : i32
    %c0_i32_0 = arith.constant 0 : i32
    %c0_i32_1 = arith.constant 0 : i32
    return %c0_i32, %c0_i32_0 : i32, i32
  }
  func.func @transform_2(%arg0: i32, %arg1: i32) -> (i32, i32, i32) {
    %c0_i32 = arith.constant 0 : i32
    %c0_i32_0 = arith.constant 0 : i32
    %c0_i32_1 = arith.constant 0 : i32
    %c0_i32_2 = arith.constant 0 : i32
    return %c0_i32, %c0_i32_0, %c0_i32_1 : i32, i32, i32
  }
  func.func @transform_3(%arg0: i32, %arg1: i32) -> (i32, i32) {
    %c0_i32 = arith.constant 0 : i32
    %c0_i32_0 = arith.constant 0 : i32
    %c0_i32_1 = arith.constant 0 : i32
    return %c0_i32, %c0_i32_0 : i32, i32
  }
  func.func @transform_4(%arg0: i32, %arg1: i32) -> (i32, i32) {
    %c0_i32 = arith.constant 0 : i32
    %c0_i32_0 = arith.constant 0 : i32
    %c0_i32_1 = arith.constant 0 : i32
    return %c0_i32, %c0_i32_0 : i32, i32
  }
  func.func @transform_5(%arg0: i32, %arg1: i32) -> (i32, i32) {
    %c0_i32 = arith.constant 0 : i32
    %c0_i32_0 = arith.constant 0 : i32
    %c0_i32_1 = arith.constant 0 : i32
    return %c0_i32, %c0_i32_0 : i32, i32
  }
  func.func @transform_6(%arg0: i32, %arg1: i32) -> (i32, i32) {
    %c0_i32 = arith.constant 0 : i32
    %c0_i32_0 = arith.constant 0 : i32
    %c0_i32_1 = arith.constant 0 : i32
    return %c0_i32, %c0_i32_0 : i32, i32
  }
  func.func @transform_7(%arg0: i32, %arg1: i32) -> (i32, i32, i32, i32) {
    %c0_i32 = arith.constant 0 : i32
    %c0_i32_0 = arith.constant 0 : i32
    %c0_i32_1 = arith.constant 0 : i32
    return %arg0, %c0_i32, %arg1, %c0_i32_0 : i32, i32, i32, i32
  }
}

</mosaic_0001>

<bundles_post_ra>
// kernel: tpu_custom_call.1
= control target key start
LH: loop header
LB: loop body
LE: loop exit
PB: predicated region body
PF: predicated region fallthrough
CT: control target
= control target key end

     0   :  { %12 = vsyncpa [#allocation5], 0  ;;  %s4256_s0 = inlined_call_operand.hbm [shape: bf16[2,8,4,290], index: 0, kind: input, shape index: {}]   ;;  %s4257_s1 = inlined_call_operand.vmem [shape: bf16[8,36], index: 1, kind: input, shape index: {}]   ;;  %s4258_s2 = inlined_call_operand.vmem [shape: bf16[3,8,8], index: 2, kind: input, shape index: {}]   ;;  %s4259_s3 = inlined_call_operand.vmem [shape: f32[8,1], index: 3, kind: input, shape index: {}]   ;;  %s4260_s4 = inlined_call_operand.vmem [shape: f32[8,1], index: 4, kind: input, shape index: {}]   ;;  %s4261_s5 = inlined_call_operand.vmem [shape: bf16[1,256], index: 5, kind: input, shape index: {}]   ;;  %s4262_s6 = inlined_call_operand.vmem [shape: bf16[1,256], index: 6, kind: input, shape index: {}]   ;;  %s4263_s7 = inlined_call_operand.hbm [shape: f32[2,8,8,256], index: 7, kind: output, shape index: {}]  }
   0x1   :  { %14 = vsyncpa [#allocation5 + $0x1], 0 }
   0x2   :  { %15 = vsyncpa [#allocation6], 0 }
   0x3   :  { %17 = vsyncpa [#allocation6 + $0x1], 0  ;;  %s3555_s24 = smov 0   ;;  %s3557_s25 = smov 0  }
   0x4   :  { %s3559_s26 = smov 0   ;;  %s3561_s27 = smov 0  }
   0x5   :  { %s3563_s28 = smov 0   ;;  %s3565_s29 = smov 0  }
   0x6 LB: > { %s3028_s30 = sadd.s32 4294967295, %s3486_s29   ;;  %s3029_s8 = sadd.s32 4294967294, %s3486_s29   ;;  %s3486_s29 = sphi %s3565_s29, %s23_s29   ;;  %s3482_s28 = sphi %s3563_s28, %s4280_s28   ;;  %s3478_s27 = sphi %s3561_s27, %s4279_s27   ;;  %s3474_s26 = sphi %s3559_s26, %s4278_s26   ;;  %s3470_s25 = sphi %s3557_s25, %s4277_s25   ;;  %s3466_s24 = sphi %s3555_s24, %s4276_s24  }
   0x7   : > { %s35_s9 = sadd.s32 1, %s3482_s28  ;;  %s42_s10 = sadd.s32 1, %s3474_s26 }
   0x8   : > { %p37_p0 = scmp.ge.s32.totalorder %s35_s9, 2  ;;  %p49_p1 = scmp.ne.s32.totalorder %s3474_s26, %s3470_s25 }
   0x9   : > { %p50_p2 = scmp.eq.s32.totalorder %s3486_s29, 0  ;;  %p55_p3 = scmp.ne.s32.totalorder %s3470_s25, %s3466_s24 }
   0xa   : > { %s4282_s9 = smov (%p37_p0, %s35_s9), 0  ;;  %p56_p5 = scmp.eq.s32.totalorder %s3028_s30, 0 }
   0xb   : > { %p3596_p4 = por %p50_p2, %p49_p1  ;;  %s39_s12 = ssub.s32 %s3482_s28, %s4282_s9 }
   0xc   : > { %p207_p6 = scmp.eq.s32.totalorder %s3028_s30, 1  ;;  %p40_p7 = scmp.eq.s32.totalorder %s39_s12, 0 }
   0xd   : > { %p3602_p8 = por %p56_p5, %p55_p3  ;;  %p213_p10 = scmp.eq.s32.totalorder %s3029_s8, 1 }
   0xe   : > { %p3606_p9 = por %p207_p6, %p49_p1  ;;  %p3257_p13 = scmp.lt.s32.totalorder %s3486_s29, 2 }
   0xf   : > { %s3611_s15 = scalar_select %p40_p7, %s3474_s26, %s42_s10  }
  0x10   : > { %s4267_s14 = scalar_select %p3606_p9, 1, 0 }
  0x11   : > { %p3613_p11 = por %p213_p10, %p55_p3  ;;  %s251_s17 = sand.u32 1, %s3474_s26  }
  0x12   : > { %s3242_s18 = smul.u32 48, %s251_s17  ;;  %p3623_p0 = pnand %p3257_p13, %p3596_p4 }
  0x13   : > { %s4268_s16 = scalar_select %p3613_p11, 1, 0 }
  0x14   : > { %s3243_s19 = smul.u32 768, %s3482_s28  ;;  %s255_s30 = scalar_lea.vmem [#allocation4], %s3242_s18 }
  0x15   : > { %s262_s8 = sshll.u32 %s255_s30, 4  ;;  %s3635_s10 = scalar_lea.sflag [#allocation5], %s251_s17  ;;  %s3632_s8 = int_to_ptr.vmem [resolvable:$true] %s262_s8 }
  0x16   : > { %s3630_s23 = scalar_lea.hbm %s4256_s0, %s3243_s19  ;;  %p3372_p3 = pneg %p3623_p0 }
  0x17   : > { %s3370_s11 = scalar_lea.hbm %s3630_s23, 768  ;;  %s3375_s21 = scalar_lea.hbm %s4256_s0, 1536 }
  0x18   : > { %p3371_p2 = scmp.ne.s32.totalorder %s3630_s23, %s3370_s11  ;;  %p3376_p6 = scmp.lt.u32.totalorder %s3630_s23, %s4256_s0 }
  0x19   : > { %p3377_p7 = scmp.lt.u32.totalorder %s3375_s21, %s3370_s11  ;;  %p3379_p13 = scmp.lt.u32.totalorder %s3370_s11, %s3630_s23 }
  0x1a   : > { %p3373_p4 = pnand %p3372_p3, %p3371_p2 }
  0x1b   : > { %p3378_p10 = por %p3377_p7, %p3376_p6 }
  0x1c   : > { %p3374_p5 = pneg %p3373_p4 }
  0x1d   : > { %p3380_p12 = por %p3379_p13, %p3378_p10 }
  0x1f   : > { %p3381_p1 = pnand %p3380_p12, %p3374_p5 }
  0x21   : > { %3384 = shalt.err (!%p3381_p1)
}
  0x22   : > { %s3385_s17 = scalar_lea.vmem %s3632_s8, 768  ;;  %s3492_s30 = smov [#allocation4]  }
  0x23   : > { %p3386_p2 = scmp.ne.s32.totalorder %s3632_s8, %s3385_s17  ;;  %s3390_s12 = sshll.u32 %s3492_s30, 4  ;;  %s3391_s12 = int_to_ptr.vmem [resolvable:$false] %s3390_s12 }
  0x24   : > { %s3392_s19 = scalar_lea.vmem %s3391_s12, 1536  ;;  %p3393_p9 = scmp.lt.s32.totalorder %s3632_s8, %s3391_s12 }
  0x25   : > { %p3388_p4 = pnand %p3386_p2, %p3372_p3  ;;  %p3394_p6 = scmp.lt.s32.totalorder %s3392_s19, %s3385_s17 }
  0x27   : > { %p3389_p11 = pneg %p3388_p4  ;;  %p3395_p7 = por %p3394_p6, %p3393_p9 }
  0x29   : > { %p3396_p10 = pnand %p3395_p7, %p3389_p11 }
  0x2b   : > { %3399 = shalt.err (!%p3396_p10)
}
  0x2c   : > { %s3493_s11 = smov 96   ;;  %s3494_s21 = smov 6  }
  0x2d   : > { %3252 = dma.hbm_to_vmem [thread:$0]  (!%p3623_p0), %s3630_s23, 768, %s3632_s8, %s3635_s10, %s3493_s11, %s3493_s11, %s3494_s21  }
  0x2e   : > { %p270_p12 = scmp.lt.s32.totalorder %s3486_s29, 3  ;;  %p4270_p1 = scmp.ge.s32.totalorder %s3486_s29, 1 }
  0x30   : > { %p271_p3 = pnand %p4270_p1, %p270_p12 }
  0x31   : > { %s3667_s22 = sand.u32 (!%p271_p3), 1, %s3470_s25  }
  0x32   : > { %274 = sbr.rel (%p271_p3) target bundleno = 926 (0x39e), region = 48  ;;  %s277_s17 = scalar_lea.sflag (!%p271_p3), [#allocation5], %s3667_s22 }
  0x33   : > { %s3244_s18 = smul.u32 (!%p271_p3), 48, %s3667_s22 }
  0x35   : > { %s3671_s30 = scalar_lea.vmem (!%p271_p3), [#allocation4], %s3244_s18 }
  0x39   : > { %3457 = dma.done.wait (%p3602_p8), %s277_s17, 768  }
  0x3a   : > { %3459 = vsyncadd (%p3602_p8), %s277_s17, 4294966528  ;;  %s3034_s20 = sshll.u32 %s3667_s22, 7  ;;  %v3681_v0 = vld [vmem:[%s4257_s1] sm:$0xf]  ;;  %s3705_s8 = smov 0  }
  0x3b   : > { %v3686_v1 = vld [vmem:[%s4259_s3] sm:$0xff]  ;;  %s3703_s23 = scalar_lea.vmem [#allocation7], %s3034_s20 }
  0x3c   : > { %v3691_v2 = vld [vmem:[%s4260_s4] sm:$0xff] }
  0x3d   : > { %v3696_v3 = vld.sshfl [vmem:[%s4261_s5] sm:$0x11 pattern:$0x75316420] }
  0x3e   : > { %v3701_v4 = vld.sshfl [vmem:[%s4262_s6] sm:$0x11 pattern:$0x75316420] }
  0x3f LB: >> { %v346_v5 = vlaneseq  ;;  %v3495_v6 = vmov 1966171168   ;;  %v3496_v9 = vmov 1983009808   ;;  %v431_v12 = vcombine.high %v3701_v4, %v3701_v4  ;;  %s3716_s20 = sadd.s32 4294967295, %s3490_s8  ;;  %s3497_s11 = smov 18   ;;  %s3490_s8 = sphi %s3705_s8, %s324_s8  }
  0x40   : >> { %v344_v7 = vunpack.c.l.s4 %v3495_v6  ;;  %v375_v10 = vunpack.c.l.s4 %v3496_v9  ;;  %v342_v13 = vcombine.high %v3696_v3, %v3696_v3  ;;  %p326_p8 = scmp.gt.s32.totalorder %s3716_s20, 0  ;;  %p3035_p9 = scmp.lt.s32.totalorder %s3716_s20, 7  ;;  %vm473_vm0 = vcmask 15360  }
  0x41   : >> { %v347_v8 = vshrl.u32 %v346_v5, 7  ;;  %s3498_s21 = smov 2   ;;  %s3499_s13 = smov 32   ;;  %vm571_vm1 = vcmask 146432   ;;  %vm606_vm2 = vcmask 261120   ;;  %vm508_vm3 = vcmask 130048  }
  0x42   : >> { %v345_v11 = vunpack.c.0.s8 %v344_v7  ;;  %v376_v16 = vunpack.c.0.s8 %v375_v10  ;;  %s327_s10 = scalar_select %p326_p8, %s3716_s20, 0  ;;  %vm669_vm4 = vcmask 277504   ;;  %vm416_vm5 = vcmask 1043456  }
  0x43   : >> { %v362_v15 = vsub.s32 0, %v347_v8  ;;  %s3500_s18 = smov 16   ;;  %s3501_s17 = smov 34   ;;  %vm418_vm6 = vcmask 1039360   ;;  %vm563_vm7 = vcmask 908288   ;;  %vm661_vm8 = vcmask 777216  }
  0x44   : >> { %v3720_v14 = vsub.s32 %v345_v11, %v347_v8  ;;  %s4284_s10 = smov (!%p3035_p9, %s327_s10), 7  ;;  %v3729_v25 = vsub.s32 %v376_v16, %v347_v8  ;;  %vm535_vm9 = vcmask 916480   ;;  %vm500_vm10 = vcmask 1031168   ;;  %p789_p11 = scmp.ge.s32.totalorder %s3716_s20, 0 }
  0x45   : >> { %s3238_s12 = smul.u32 6, %s4284_s10  ;;  %s3502_s10 = smov 111   ;;  %vm598_vm11 = vcmask 900096   ;;  %vm633_vm12 = vcmask 785408   ;;  %vm696_vm13 = vcmask 769024   ;;  %vm739_vm14 = vcmask 1041408  }
  0x46   : >> { %v438_v17 = vrot.slane %v3701_v4, %v3720_v14  ;;  %v445_v18 = vrot.slane %v431_v12, %v3720_v14  ;;  %v349_v19 = vrot.slane %v3696_v3, %v3720_v14  ;;  %v356_v20 = vrot.slane %v342_v13, %v3720_v14  ;;  %p790_p0 = scmp.lt.s32.totalorder %s3716_s20, 8 }
  0x47   : >> { %s3732_s19 = scalar_lea.vmem %s3671_s30, %s3238_s12 [#allocation4]  ;;  %s3503_s12 = smov 127   ;;  %vm735_vm15 = vcmask 293888  }
  0x48   : >> { %v447_v21 = vpack.i.b16 %v438_v17, %v438_v17  ;;  %v454_v22 = vpack.i.b16 %v445_v18, %v445_v18  ;;  %v358_v23 = vpack.i.b16 %v349_v19, %v349_v19  ;;  %v365_v24 = vpack.i.b16 %v356_v20, %v356_v20  ;;  %v333_v32 = vld [vmem:[%s3732_s19] sm:$0xf]  ;;  %p791_p5 = pnand %p790_p0, %p789_p11 }
  0x49   : >> { %v539_v36 = vld [vmem:[%s3732_s19] sm:$0x3f] }
  0x4a   : >> { %v452_v26 = vrot.slane %v447_v21, %v362_v15  ;;  %v459_v27 = vrot.slane %v454_v22, %v362_v15  ;;  %v363_v28 = vrot.slane %v358_v23, %v362_v15  ;;  %v370_v29 = vrot.slane %v365_v24, %v362_v15  ;;  %v393_v37 = vld [vmem:[%s3732_s19] sm:$0x3f] }
  0x4b   : >> { %v548_v38 = vrot.slane %v539_v36, %v3729_v25  ;;  %v395_v39 = vcombine.low %v393_v37, %v393_v37  ;;  %v637_v40 = vld [vmem:[%s3732_s19] sm:$0x3f]  ;;  %v409_v41 = vrot.slane %v393_v37, %v3729_v25  ;;  %v541_v42 = vcombine.high %v539_v36, %v539_v36 }
  0x4c   : >> { %v462_v30 = vcombine.low %v452_v26, %v459_v27  ;;  %v373_v31 = vcombine.low %v363_v28, %v370_v29  ;;  %v639_v44 = vcombine.low %v637_v40, %v637_v40  ;;  %v653_v47 = vrot.slane %v637_v40, %v3729_v25  ;;  %v422_v50 = vld [vmem:[%s3732_s19] sm:$0x3f] }
  0x4d   : >> { %v402_v43 = vrot.slane %v395_v39, %v3729_v25  ;;  %v555_v45 = vrot.slane %v541_v42, %v3729_v25  ;;  %v602_v57 = vld [vmem:[%s3732_s19] sm:$0x3f] }
  0x4e   : >> { %v469_v33 = vrot.slane %v462_v30, %v3729_v25  ;;  %v380_v34 = vrot.slane %v373_v31, %v3729_v25  ;;  %v646_v46 = vrot.slane %v639_v44, %v3729_v25  ;;  %v504_v59 = vld [vmem:[%s3732_s19] sm:$0x3f] }
  0x4f   : >> { %v567_v62 = vld [vmem:[%s3732_s19] sm:$0x3f] }
  0x50   : >> { %568 = vrot.lane.b32.xlu1 %v469_v33, %s3497_s11  ;;  %470 = vrot.lane.b32.xlu0 %v469_v33, %s3498_s21  ;;  %v382_v35 = vmul.bf16 %v380_v34, %v333_v32  ;;  %s3504_s11 = smov 95   ;;  %s3505_s21 = smov 126   ;;  %v665_v20 = vld [vmem:[%s3732_s19] sm:$0x3f] }
  0x51   : >> { %s3509_s19 = smov 94  }
  0x52   : >> { %3042 = vst.sshfl [vmem:[#allocation2] sm:$0xf pattern:$0x76325410] %v382_v35 }
  0x54   : >> { %603 = vrot.lane.b32.xlu1 %v380_v34, %s3499_s13  ;;  %505 = vrot.lane.b32.xlu0 %v380_v34, %s3500_s18  ;;  %s3506_s13 = smov 112   ;;  %s3507_s18 = smov 96  }
  0x58   : >> { %666 = vrot.lane.b32.xlu0 %v469_v33, %s3501_s17  ;;  %556 = vrot.lane.b32.xlu1 %v548_v38, %s3502_s10  ;;  %s3508_s17 = smov 110  }
  0x5c   : >> { %412 = vrot.lane.b32.xlu0 %v409_v41, %s3503_s12  ;;  %410 = vrot.lane.b32.xlu1 %v402_v43, %s3503_s12 }
  0x60   : >> { %558 = vrot.lane.b32.xlu0 %v555_v45, %s3502_s10  ;;  %654 = vrot.lane.b32.xlu1 %v646_v46, %s3504_s11  ;;  %s3052_s10 = scalar_select %p791_p5, 0, 1 }
  0x62   : >> { %s794_s12 = scvt.s32.f32 %s3052_s10 }
  0x64   : >> { %656 = vrot.lane.b32.xlu0 %v653_v47, %s3504_s11  ;;  %s3240_s11 = sshll.u32 %s3490_s8, 3  ;;  %s324_s8 = sadd.s32 1, %s3490_s8  }
  0x65   : >> { %p321_p13 = scmp.ge.s32.totalorder %s324_s8, 10  }
  0x66   : > { %v3056_v4 = vld [vmem:[%s4258_s2 + $0x4] sm:$0xf] (%p321_p13)  ;;  %p4273_p4 = scmp.ne.s32.totalorder (%p321_p13), %s4267_s14, 0 }
  0xc2   : >> { %v569_v48 = vpop.permute.xlu1 %568  ;;  %v471_v49 = vpop.permute.xlu0 %470 }
  0xc3   : >> { %v472_v51 = vrot.slane %v471_v49, 6  ;;  %v570_v52 = vrot.slane %v569_v48, 6 }
  0xc5   : >> { %v474_v53 = vsel %vm473_vm0, %v472_v51, %v471_v49  ;;  %v572_v63 = vsel %vm571_vm1, %v570_v52, %v569_v48  ;;  %vm821_vm0 = vcmask (%p321_p13), 64512   ;;  %vm3944_vm1 = vcmp.lt.s32.totalorder (%p321_p13), %v346_v5, 256 }
  0xc6   : >> { %v476_v54 = vmul.bf16 %v474_v53, %v422_v50  ;;  %v604_v55 = vpop.permute.xlu1 %603  ;;  %v506_v56 = vpop.permute.xlu0 %505  ;;  %v574_v13 = vmul.bf16 %v572_v63, %v567_v62  ;;  %v3510_v50 = vmov 0  }
  0xc7   : >> { %v605_v58 = vrot.slane %v604_v55, 6  ;;  %v507_v60 = vrot.slane %v506_v56, 6  ;;  %778 = vmatprep.mubr.bf16.mxu0 %v3510_v50  ;;  %3336 = vset.pattern.permute.xlu1 %v3510_v50 }
  0xc8   : >> { %v485_v61 = vrot.slane %v476_v54, %v3729_v25  ;;  %v576_v24 = vcombine.low %v574_v13, %v574_v13  ;;  %v478_v26 = vcombine.high %v476_v54, %v476_v54  ;;  %v590_v27 = vrot.slane %v574_v13, %v3729_v25  ;;  %3337 = vset.pattern.permute.xlu0 %v3510_v50 }
  0xc9   : >> { %v607_v6 = vsel %vm606_vm2, %v605_v58, %v604_v55  ;;  %v509_v7 = vsel %vm508_vm3, %v507_v60, %v506_v56 }
  0xca   : >> { %v609_v8 = vmul.bf16 %v607_v6, %v602_v57  ;;  %v511_v9 = vmul.bf16 %v509_v7, %v504_v59  ;;  %493 = vrot.lane.b32.xlu1 %v485_v61, %s3505_s21  ;;  %v667_v10 = vpop.permute.xlu0 %666  ;;  %v557_v11 = vpop.permute.xlu1 %556  ;;  %v492_v37 = vrot.slane %v478_v26, %v3729_v25  ;;  %v583_v38 = vrot.slane %v576_v24, %v3729_v25 }
  0xcb   : >> { %v668_v12 = vrot.slane %v667_v10, 6  ;;  %v560_v29 = vrot.slane %v557_v11, 4 }
  0xcc   : >> { %v513_v15 = vcombine.low %v511_v9, %v511_v9  ;;  %v527_v16 = vrot.slane %v511_v9, %v3729_v25  ;;  %v618_v17 = vrot.slane %v609_v8, %v3729_v25  ;;  %v611_v36 = vcombine.high %v609_v8, %v609_v8 }
  0xcd   : >> { %v670_v21 = vsel %vm669_vm4, %v668_v12, %v667_v10 }
  0xce   : >> { %530 = vrot.lane.b32.xlu0 %v527_v16, %s3506_s13  ;;  %626 = vrot.lane.b32.xlu1 %v618_v17, %s3507_s18  ;;  %v413_v18 = vpop.permute.xlu0 %412  ;;  %v411_v19 = vpop.permute.xlu1 %410  ;;  %v520_v28 = vrot.slane %v513_v15, %v3729_v25  ;;  %v672_v31 = vmul.bf16 %v670_v21, %v665_v20  ;;  %v625_v46 = vrot.slane %v611_v36, %v3729_v25  ;;  %v795_v36 = vstv %s794_s12  ;;  %s2920_s12 = scalar_lea.sflag (%p321_p13), [#allocation6], %s3667_s22 }
  0xcf   : >> { %v415_v22 = vrot.slane %v413_v18, 4  ;;  %v414_v23 = vrot.slane %v411_v19, 4 }
  0xd0   : >> { %v681_v41 = vrot.slane %v672_v31, %v3729_v25  ;;  %v674_v45 = vcombine.high %v672_v31, %v672_v31 }
  0xd1   : >> { %v417_v30 = vsel %vm416_vm5, %v414_v23, %v415_v22 }
  0xd2   : >> { %593 = vrot.lane.b32.xlu0 %v590_v27, %s3508_s17  ;;  %528 = vrot.lane.b32.xlu1 %v520_v28, %s3506_s13  ;;  %v559_v32 = vpop.permute.xlu0 %558  ;;  %v419_v33 = vsel %vm418_vm6, %v411_v19, %v417_v30  ;;  %v655_v34 = vpop.permute.xlu1 %654  ;;  %v688_v49 = vrot.slane %v674_v45, %v3729_v25 }
  0xd3   : >> { %v561_v35 = vrot.slane %v559_v32, 4  ;;  %421 = vst [vmem:[#allocation2] sm:$0xcc] %v419_v33  ;;  %v658_v40 = vrot.slane %v655_v34, 4 }
  0xd5   : >> { %v562_v39 = vsel %vm416_vm5, %v560_v29, %v561_v35 }
  0xd6   : >> { %495 = vrot.lane.b32.xlu0 %v492_v37, %s3505_s21  ;;  %591 = vrot.lane.b32.xlu1 %v583_v38, %s3508_s17  ;;  %v564_v42 = vsel %vm563_vm7, %v557_v11, %v562_v39  ;;  %v657_v43 = vpop.permute.xlu0 %656  ;;  %s808_s21 = scalar_lea.vmem [#allocation3], %s3240_s11  ;;  %s2935_s17 = sshll.u32 (%p321_p13), %s3703_s23, 4  ;;  %s4189_s17 = int_to_ptr.vmem [resolvable:$true] %s2935_s17 }
  0xd7   : >> { %566 = vst [vmem:[#allocation2 + $0x10] sm:$0x33] %v564_v42  ;;  %v659_v44 = vrot.slane %v657_v43, 4  ;;  %s3400_s11 = scalar_lea.vmem (%p321_p13), %s4189_s17, 2048 }
  0xd8   : > { %p3401_p2 = scmp.ne.s32.totalorder (%p321_p13), %s4189_s17, %s3400_s11 }
  0xd9   : >> { %v660_v47 = vsel %vm416_vm5, %v658_v40, %v659_v44 }
  0xda   : >> { %628 = vrot.lane.b32.xlu0 %v625_v46, %s3507_s18  ;;  %689 = vrot.lane.b32.xlu1 %v681_v41, %s3509_s19  ;;  %v662_v48 = vsel %vm661_vm8, %v655_v34, %v660_v47  ;;  %s3241_s18 = sshll.u32 (%p321_p13), %s3478_s27, 11  ;;  %p3402_p6 = pnand (%p321_p13), %p3401_p2, %p4273_p4 }
  0xdb   : >> { %664 = vst [vmem:[#allocation2 + $0x18] sm:$0xcc] %v662_v48  ;;  %s4187_s27 = scalar_lea.hbm (%p321_p13), %s4263_s7, %s3241_s18 }
  0xdc   : > { %p3403_p7 = pneg (%p321_p13), %p3402_p6 }
  0xde   : >> { %691 = vrot.lane.b32.xlu0 %v688_v49, %s3509_s19  ;;  %707 = vperm.xlu1 %3336, %v3686_v1  }
 0x13c   : >> { %v494_v51 = vpop.permute.xlu1 %493 }
 0x13d   : >> { %v497_v61 = vrot.slane %v494_v51, 4 }
 0x140   : >> { %v531_v52 = vpop.permute.xlu0 %530  ;;  %v627_v53 = vpop.permute.xlu1 %626 }
 0x141   : >> { %v533_v56 = vrot.slane %v531_v52, 4  ;;  %v630_v12 = vrot.slane %v627_v53, 4 }
 0x144   : >> { %v594_v54 = vpop.permute.xlu0 %593  ;;  %v529_v55 = vpop.permute.xlu1 %528 }
 0x145   : >> { %v532_v57 = vrot.slane %v529_v55, 4  ;;  %v596_v62 = vrot.slane %v594_v54, 4 }
 0x147   : >> { %v534_v58 = vsel %vm416_vm5, %v532_v57, %v533_v56 }
 0x148   : >> { %v536_v59 = vsel %vm535_vm9, %v529_v55, %v534_v58  ;;  %v496_v25 = vpop.permute.xlu0 %495  ;;  %v592_v60 = vpop.permute.xlu1 %591  ;;  %v810_v55 = vld [vmem:[%s4258_s2] sm:$0xf] (%p321_p13) }
 0x149   : >> { %538 = vst [vmem:[#allocation2 + $0x8] sm:$0xcc] %v536_v59  ;;  %v498_v63 = vrot.slane %v496_v25, 4  ;;  %v595_v6 = vrot.slane %v592_v60, 4  ;;  %v3065_v59 = vld [vmem:[%s4258_s2 + $0x8] sm:$0xf] (%p321_p13) }
 0x14b   : >> { %v499_v7 = vsel %vm416_vm5, %v497_v61, %v498_v63  ;;  %v597_v8 = vsel %vm416_vm5, %v595_v6, %v596_v62  ;;  %v1085_v61 = vld [vmem:[%s4258_s2] sm:$0xf] (%p321_p13)  ;;  %v3086_v62 = vld [vmem:[%s4258_s2 + $0x8] sm:$0xf] (%p321_p13) }
 0x14c   : >> { %v501_v9 = vsel %vm500_vm10, %v494_v51, %v499_v7  ;;  %v599_v10 = vsel %vm598_vm11, %v592_v60, %v597_v8  ;;  %v629_v11 = vpop.permute.xlu0 %628  ;;  %v690_v15 = vpop.permute.xlu1 %689  ;;  %v3511_v51 = vmov (%p321_p13), 0   ;;  %v3099_v8 = vld [vmem:[%s4258_s2 + $0x4] sm:$0xf] (%p321_p13) }
 0x14d   : >> { %503 = vst [vmem:[#allocation2 + $0x8] sm:$0x33] %v501_v9  ;;  %601 = vst [vmem:[#allocation2 + $0x10] sm:$0xcc] %v599_v10  ;;  %v631_v13 = vrot.slane %v629_v11, 4  ;;  %v693_v19 = vrot.slane %v690_v15, 4  ;;  %919 = vmatprep.mubr.bf16.mxu1 (%p321_p13), %v3511_v51  ;;  %3349 = vset.pattern.permute.xlu0 (%p321_p13), %v3511_v51 }
 0x14e   : > { %991 = vperm.xlu0 (%p321_p13), %3349, %v3691_v2   ;;  %v3077_v2 = vld [vmem:[%s4258_s2 + $0x4] sm:$0xf] (%p321_p13)  ;;  %v1347_v9 = vld [vmem:[%s4258_s2] sm:$0xf] (%p321_p13) }
 0x14f   : >> { %v632_v16 = vsel %vm416_vm5, %v630_v12, %v631_v13  ;;  %v3108_v13 = vld [vmem:[%s4258_s2 + $0x8] sm:$0xf] (%p321_p13) }
 0x150   : >> { %v634_v17 = vsel %vm633_vm12, %v627_v53, %v632_v16  ;;  %v692_v18 = vpop.permute.xlu0 %691 }
 0x151   : >> { %636 = vst [vmem:[#allocation2 + $0x18] sm:$0x33] %v634_v17  ;;  %v694_v20 = vrot.slane %v692_v18, 4  ;;  %v1609_v18 = vld [vmem:[%s4258_s2] sm:$0xf] (%p321_p13) }
 0x153   : >> { %v695_v21 = vsel %vm416_vm5, %v693_v19, %v694_v20  ;;  %v3130_v19 = vld [vmem:[%s4258_s2 + $0x8] sm:$0xf] (%p321_p13) }
 0x154   : >> { %v697_v22 = vsel %vm696_vm13, %v690_v15, %v695_v21  ;;  %v3341_v23 = vld [vmem:[#allocation2 + $0x4] ss:$8 sps:$4 sm:$0xff]   ;;  %v3343_v24 = vld [vmem:[#allocation2] ss:$8 sps:$4 sm:$0xff]  }
 0x155   : >> { %699 = vst [vmem:[#allocation2 + $0x20] sm:$0x33] %v697_v22  ;;  %746 = vmatprep.subr.bf16.mxu0 %v3341_v23  ;;  %v3121_v15 = vld [vmem:[%s4258_s2 + $0x4] sm:$0xf] (%p321_p13) }
 0x156   : >> { %747 = vmatpush1.bf16.msra.mxu0 %v3343_v24  ;;  %v3143_v23 = vld [vmem:[%s4258_s2 + $0x4] sm:$0xf] (%p321_p13)  ;;  %v1871_v24 = vld [vmem:[%s4258_s2] sm:$0xf] (%p321_p13) }
 0x158   : >> { %v3344_v26 = vld [vmem:[#allocation2 + $0x14] ss:$8 sps:$4 sm:$0xff]   ;;  %v3346_v27 = vld [vmem:[#allocation2 + $0x10] ss:$8 sps:$4 sm:$0xff]  }
 0x159   : >> { %748 = vmatprep.subr.bf16.mxu0 %v3344_v26 }
 0x15a   : >> { %749 = vmatpush1.bf16.msra.mxu0 %v3346_v27 }
 0x15c   : >> { %v704_v28 = vld [vmem:[#allocation2 + $0x20] sm:$0x33] }
 0x15d   : >> { %v3049_v29 = vcombine.high %v704_v28, %v704_v28  ;;  %v3048_v30 = vcombine.low %v704_v28, %v704_v28  ;;  %v708_v32 = vpop.permute.xlu1 %707 }
 0x15f   : >> { %3050 = vmatprep.subr.msk.bf16.mxu0 %vm739_vm14, %v3049_v29  ;;  %v741_v31 = vsel %vm739_vm14, %v3048_v30, 0  ;;  %v3152_v29 = vld [vmem:[%s4258_s2 + $0x8] sm:$0xf] (%p321_p13)  ;;  %v3165_v30 = vld [vmem:[%s4258_s2 + $0x4] sm:$0xf] (%p321_p13) }
 0x160   : >> { %751 = vmatpush1.bf16.msra.mxu0 %v741_v31 }
 0x163   : >> { %3051 = vmatmul.mubr.msk.bf16.vlgmr.msra.gmra.mrb[0].mxu0 %vm735_vm15, %v3681_v0 }
 0x164   : > { %864 = vmatprep.mubr.bf16.mxu0 (%p321_p13), %v3511_v51 }
 0x236   : >> { %v780_v33 = vpop.f32.mrb[0].mxu0 }
 0x237   : >> { %v781_v34 = vadd.f32 %v780_v33, %v708_v32  ;;  %v782_v35 = vpop.f32.mrb[1].mxu0  ;;  %v2133_v33 = vld [vmem:[%s4258_s2] sm:$0xf] (%p321_p13) }
 0x238   : >> { %v783_v37 = vadd.f32 %v782_v35, %v708_v32  ;;  %v784_v38 = vpop.f32.mrb[2].mxu0 }
 0x239   : >> { %v787_v39 = vmax.f32 %v781_v34, 0.0  ;;  %v785_v40 = vpop.f32.mrb[3].mxu0  ;;  %v3174_v34 = vld [vmem:[%s4258_s2 + $0x8] sm:$0xf] (%p321_p13)  ;;  %v3187_v38 = vld [vmem:[%s4258_s2 + $0x4] sm:$0xf] (%p321_p13) }
 0x23a   : >> { %v788_v41 = vmax.f32 %v783_v37, 0.0  ;;  %323 = sbr.rel (!%p321_p13) target bundleno = 63 (0x3f), region = 176 }
 0x23b   : >> { %v796_v42 = vmul.f32 %v795_v36, %v787_v39  ;;  %v2395_v39 = vld [vmem:[%s4258_s2] sm:$0xf] (%p321_p13) }
 0x23c   : >> { %v797_v43 = vmul.f32 %v795_v36, %v788_v41 }
 0x23e   : >> { %v3239_v44 = vpack.c.bf16 %v797_v43, %v796_v42  ;;  %v3196_v43 = vld [vmem:[%s4258_s2 + $0x8] sm:$0xf] (%p321_p13) }
 0x240   : >> { %809 = vst [vmem:[%s808_s21] sm:$0xff] %v3239_v44  ;;  %v3209_v44 = vld [vmem:[%s4258_s2 + $0x4] sm:$0xf] (%p321_p13)  ;;  %s3512_s21 = smov (%p321_p13), [#allocation7]  }
 0x241   : > { %s3404_s30 = sshll.u32 %s3512_s21, 4  ;;  %s3405_s30 = int_to_ptr.vmem [resolvable:$false] %s3404_s30 }
 0x242   : > { %s3406_s8 = scalar_lea.vmem %s3405_s30, 4096  ;;  %p3407_p10 = scmp.lt.s32.totalorder %s4189_s17, %s3405_s30 }
 0x243   : > { %p3408_p12 = scmp.lt.s32.totalorder %s3406_s8, %s3400_s11 }
 0x245   : > { %p3409_p1 = por %p3408_p12, %p3407_p10 }
 0x247   : > { %v815_v45 = vld [vmem:[#allocation3 + $0x8] sm:$0xff]  ;;  %v811_v46 = vld [vmem:[#allocation3] sm:$0xff]  ;;  %v931_v52 = vld [vmem:[#allocation3 + $0x10] sm:$0xff]  ;;  %p3410_p3 = pnand %p3409_p1, %p3403_p7 }
 0x248   : > { %v3058_v47 = vcombine.high %v815_v45, %v815_v45  ;;  %v3062_v48 = vcombine.high %v811_v46, %v811_v46  ;;  %v3057_v49 = vcombine.low %v815_v45, %v815_v45  ;;  %v3061_v50 = vcombine.low %v811_v46, %v811_v46  ;;  %v1201_v3 = vld [vmem:[#allocation3 + $0x18] sm:$0xff]  ;;  %v1463_v60 = vld [vmem:[#allocation3 + $0x20] sm:$0xff]  ;;  %v1725_v7 = vld [vmem:[#allocation3 + $0x28] sm:$0xff] }
 0x249   : > { %v3067_v53 = vcombine.high %v931_v52, %v931_v52  ;;  %v3066_v54 = vcombine.low %v931_v52, %v931_v52  ;;  %v3088_v57 = vcombine.high %v1201_v3, %v1201_v3  ;;  %v3087_v58 = vcombine.low %v1201_v3, %v1201_v3  ;;  %v1987_v17 = vld [vmem:[#allocation3 + $0x30] sm:$0xff]  ;;  %v2249_v22 = vld [vmem:[#allocation3 + $0x38] sm:$0xff]  ;;  %v2511_v32 = vld [vmem:[#allocation3 + $0x40] sm:$0xff] }
 0x24a   : > { %3059 = vmatprep.subr.msk.bf16.mxu0 %vm416_vm5, %v3058_v47  ;;  %3063 = vmatprep.subr.msk.bf16.mxu1 %vm416_vm5, %v3062_v48  ;;  %v827_v0 = vsel %vm416_vm5, %v3057_v49, 0  ;;  %v882_v1 = vsel %vm416_vm5, %v3061_v50, 0  ;;  %v3110_v63 = vcombine.high %v1463_v60, %v1463_v60  ;;  %v3109_v6 = vcombine.low %v1463_v60, %v1463_v60  ;;  %v2773_v37 = vld [vmem:[#allocation3 + $0x48] sm:$0xff]  ;;  %v2657_v46 = vld [vmem:[%s4258_s2] sm:$0xf] }
 0x24b   : > { %833 = vmatpush1.bf16.msra.mxu0 %v827_v0  ;;  %888 = vmatpush1.bf16.msra.mxu1 %v882_v1  ;;  %v941_v56 = vsel %vm416_vm5, %v3066_v54, 0  ;;  %v1211_v25 = vsel %vm416_vm5, %v3087_v58, 0  ;;  %v3132_v11 = vcombine.high %v1725_v7, %v1725_v7  ;;  %v3131_v12 = vcombine.low %v1725_v7, %v1725_v7 }
 0x24c   : > { %3068 = vmatprep.subr.msk.bf16.mxu0 %vm416_vm5, %v3067_v53  ;;  %3080 = vmatprep.subr.msk.bf16.mxu1 %vm416_vm5, %v3067_v53  ;;  %v1473_v10 = vsel %vm416_vm5, %v3109_v6, 0  ;;  %v3154_v20 = vcombine.high %v1987_v17, %v1987_v17  ;;  %v3153_v21 = vcombine.low %v1987_v17, %v1987_v17  ;;  %v3176_v27 = vcombine.high %v2249_v22, %v2249_v22 }
 0x24d   : > { %v1735_v16 = vsel %vm416_vm5, %v3131_v12, 0  ;;  %v3175_v28 = vcombine.low %v2249_v22, %v2249_v22  ;;  %v3198_v35 = vcombine.high %v2511_v32, %v2511_v32  ;;  %v3197_v36 = vcombine.low %v2511_v32, %v2511_v32 }
 0x24e   : > { %3060 = vmatmul.mubr.msk.bf16.vlgmr.msra.gmra.mrb[0].mxu0 %vm821_vm0, %v3056_v4  ;;  %3064 = vmatmul.mubr.msk.bf16.vlgmr.msra.gmra.mrb[0].mxu1 %vm821_vm0, %v810_v55  ;;  %v1997_v26 = vsel %vm416_vm5, %v3153_v21, 0  ;;  %v3220_v41 = vcombine.high %v2773_v37, %v2773_v37  ;;  %v3219_v42 = vcombine.low %v2773_v37, %v2773_v37  ;;  %v3937_v4 = vpop.permute.xlu0 %991 }
 0x24f   : > { %947 = vmatpush1.bf16.msra.mxu0 %v941_v56  ;;  %1104 = vmatpush1.bf16.msra.mxu1 %v941_v56  ;;  %v2259_v31 = vsel %vm416_vm5, %v3175_v28, 0  ;;  %v2521_v40 = vsel %vm416_vm5, %v3197_v36, 0 }
 0x250   : > { %978 = vmatprep.mubr.bf16.mxu0 %v3511_v51  ;;  %1135 = vmatprep.mubr.bf16.mxu1 %v3511_v51  ;;  %v2783_v45 = vsel %vm416_vm5, %v3219_v42, 0 }
 0x251   : > { %3084 = vmatprep.subr.msk.bf16.mxu0 %vm416_vm5, %v3058_v47  ;;  %3089 = vmatprep.subr.msk.bf16.mxu1 %vm416_vm5, %v3088_v57  ;;  %v3218_v47 = vld [vmem:[%s4258_s2 + $0x8] sm:$0xf] }
 0x256   : > { %3069 = vmatmul.mubr.msk.bf16.vlgmr.msra.gmra.mrb[4].mxu0 %vm821_vm0, %v3065_v59  ;;  %3081 = vmatmul.mubr.msk.bf16.vlgmr.msra.gmra.mrb[4].mxu1 %vm821_vm0, %v3077_v2 }
 0x257   : > { %1159 = vmatpush1.bf16.msra.mxu0 %v827_v0  ;;  %1217 = vmatpush1.bf16.msra.mxu1 %v1211_v25 }
 0x258   : > { %1190 = vmatprep.mubr.bf16.mxu0 %v3511_v51  ;;  %1248 = vmatprep.mubr.bf16.mxu1 %v3511_v51 }
 0x259   : > { %3102 = vmatprep.subr.msk.bf16.mxu0 %vm416_vm5, %v3088_v57  ;;  %3106 = vmatprep.subr.msk.bf16.mxu1 %vm416_vm5, %v3067_v53 }
 0x25e   : > { %3085 = vmatmul.mubr.msk.bf16.vlgmr.msra.gmra.mrb[8].mxu0 %vm821_vm0, %v1085_v61  ;;  %3090 = vmatmul.mubr.msk.bf16.vlgmr.msra.gmra.mrb[8].mxu1 %vm821_vm0, %v3086_v62 }
 0x25f   : > { %1366 = vmatpush1.bf16.msra.mxu0 %v1211_v25  ;;  %1421 = vmatpush1.bf16.msra.mxu1 %v941_v56 }
 0x260   : > { %1397 = vmatprep.mubr.bf16.mxu0 %v3511_v51  ;;  %1452 = vmatprep.mubr.bf16.mxu1 %v3511_v51 }
 0x261   : > { %3111 = vmatprep.subr.msk.bf16.mxu0 %vm416_vm5, %v3110_v63  ;;  %3124 = vmatprep.subr.msk.bf16.mxu1 %vm416_vm5, %v3110_v63 }
 0x266   : > { %3103 = vmatmul.mubr.msk.bf16.vlgmr.msra.gmra.mrb[12].mxu0 %vm821_vm0, %v3099_v8  ;;  %3107 = vmatmul.mubr.msk.bf16.vlgmr.msra.gmra.mrb[12].mxu1 %vm821_vm0, %v1347_v9 }
 0x267   : > { %1479 = vmatpush1.bf16.msra.mxu0 %v1473_v10  ;;  %1628 = vmatpush1.bf16.msra.mxu1 %v1473_v10 }
 0x268   : > { %1510 = vmatprep.mubr.bf16.mxu0 %v3511_v51  ;;  %1659 = vmatprep.mubr.bf16.mxu1 %v3511_v51 }
 0x269   : > { %3128 = vmatprep.subr.msk.bf16.mxu0 %vm416_vm5, %v3088_v57  ;;  %3133 = vmatprep.subr.msk.bf16.mxu1 %vm416_vm5, %v3132_v11 }
 0x26e   : > { %3112 = vmatmul.mubr.msk.bf16.vlgmr.msra.gmra.mrb[16].mxu0 %vm821_vm0, %v3108_v13  ;;  %3125 = vmatmul.mubr.msk.bf16.vlgmr.msra.gmra.mrb[16].mxu1 %vm821_vm0, %v3121_v15 }
 0x26f   : > { %1683 = vmatpush1.bf16.msra.mxu0 %v1211_v25  ;;  %1741 = vmatpush1.bf16.msra.mxu1 %v1735_v16 }
 0x270   : > { %1714 = vmatprep.mubr.bf16.mxu0 %v3511_v51  ;;  %1772 = vmatprep.mubr.bf16.mxu1 %v3511_v51 }
 0x271   : > { %3146 = vmatprep.subr.msk.bf16.mxu0 %vm416_vm5, %v3132_v11  ;;  %3150 = vmatprep.subr.msk.bf16.mxu1 %vm416_vm5, %v3110_v63 }
 0x276   : > { %3129 = vmatmul.mubr.msk.bf16.vlgmr.msra.gmra.mrb[20].mxu0 %vm821_vm0, %v1609_v18  ;;  %3134 = vmatmul.mubr.msk.bf16.vlgmr.msra.gmra.mrb[20].mxu1 %vm821_vm0, %v3130_v19 }
 0x277   : > { %1890 = vmatpush1.bf16.msra.mxu0 %v1735_v16  ;;  %1945 = vmatpush1.bf16.msra.mxu1 %v1473_v10 }
 0x278   : > { %1921 = vmatprep.mubr.bf16.mxu0 %v3511_v51  ;;  %1976 = vmatprep.mubr.bf16.mxu1 %v3511_v51 }
 0x279   : > { %3155 = vmatprep.subr.msk.bf16.mxu0 %vm416_vm5, %v3154_v20  ;;  %3168 = vmatprep.subr.msk.bf16.mxu1 %vm416_vm5, %v3154_v20 }
 0x27e   : > { %3147 = vmatmul.mubr.msk.bf16.vlgmr.msra.gmra.mrb[24].mxu0 %vm821_vm0, %v3143_v23  ;;  %3151 = vmatmul.mubr.msk.bf16.vlgmr.msra.gmra.mrb[24].mxu1 %vm821_vm0, %v1871_v24 }
 0x27f   : > { %2003 = vmatpush1.bf16.msra.mxu0 %v1997_v26  ;;  %2152 = vmatpush1.bf16.msra.mxu1 %v1997_v26 }
 0x280   : > { %2034 = vmatprep.mubr.bf16.mxu0 %v3511_v51  ;;  %2183 = vmatprep.mubr.bf16.mxu1 %v3511_v51 }
 0x281   : > { %3172 = vmatprep.subr.msk.bf16.mxu0 %vm416_vm5, %v3132_v11  ;;  %3177 = vmatprep.subr.msk.bf16.mxu1 %vm416_vm5, %v3176_v27 }
 0x286   : > { %3156 = vmatmul.mubr.msk.bf16.vlgmr.msra.gmra.mrb[28].mxu0 %vm821_vm0, %v3152_v29  ;;  %3169 = vmatmul.mubr.msk.bf16.vlgmr.msra.gmra.mrb[28].mxu1 %vm821_vm0, %v3165_v30 }
 0x287   : > { %2207 = vmatpush1.bf16.msra.mxu0 %v1735_v16  ;;  %2265 = vmatpush1.bf16.msra.mxu1 %v2259_v31 }
 0x288   : > { %2238 = vmatprep.mubr.bf16.mxu0 %v3511_v51  ;;  %2296 = vmatprep.mubr.bf16.mxu1 %v3511_v51 }
 0x289   : > { %3190 = vmatprep.subr.msk.bf16.mxu0 %vm416_vm5, %v3176_v27  ;;  %3194 = vmatprep.subr.msk.bf16.mxu1 %vm416_vm5, %v3154_v20 }
 0x28e   : > { %3173 = vmatmul.mubr.msk.bf16.vlgmr.msra.gmra.mrb[32].mxu0 %vm821_vm0, %v2133_v33  ;;  %3178 = vmatmul.mubr.msk.bf16.vlgmr.msra.gmra.mrb[32].mxu1 %vm821_vm0, %v3174_v34 }
 0x28f   : > { %2414 = vmatpush1.bf16.msra.mxu0 %v2259_v31  ;;  %2469 = vmatpush1.bf16.msra.mxu1 %v1997_v26 }
 0x290   : > { %2445 = vmatprep.mubr.bf16.mxu0 %v3511_v51  ;;  %2500 = vmatprep.mubr.bf16.mxu1 %v3511_v51 }
 0x291   : > { %3199 = vmatprep.subr.msk.bf16.mxu0 %vm416_vm5, %v3198_v35  ;;  %3212 = vmatprep.subr.msk.bf16.mxu1 %vm416_vm5, %v3198_v35 }
 0x296   : > { %3191 = vmatmul.mubr.msk.bf16.vlgmr.msra.gmra.mrb[36].mxu0 %vm821_vm0, %v3187_v38  ;;  %3195 = vmatmul.mubr.msk.bf16.vlgmr.msra.gmra.mrb[36].mxu1 %vm821_vm0, %v2395_v39 }
 0x297   : > { %2527 = vmatpush1.bf16.msra.mxu0 %v2521_v40  ;;  %2676 = vmatpush1.bf16.msra.mxu1 %v2521_v40 }
 0x298   : > { %2558 = vmatprep.mubr.bf16.mxu0 %v3511_v51  ;;  %2707 = vmatprep.mubr.bf16.mxu1 %v3511_v51 }
 0x299   : > { %3216 = vmatprep.subr.msk.bf16.mxu0 %vm416_vm5, %v3176_v27  ;;  %3221 = vmatprep.subr.msk.bf16.mxu1 %vm416_vm5, %v3220_v41 }
 0x29e   : > { %3200 = vmatmul.mubr.msk.bf16.vlgmr.msra.gmra.mrb[40].mxu0 %vm821_vm0, %v3196_v43  ;;  %3213 = vmatmul.mubr.msk.bf16.vlgmr.msra.gmra.mrb[40].mxu1 %vm821_vm0, %v3209_v44 }
 0x29f   : > { %2731 = vmatpush1.bf16.msra.mxu0 %v2259_v31  ;;  %2789 = vmatpush1.bf16.msra.mxu1 %v2783_v45 }
 0x2a0   : > { %2762 = vmatprep.mubr.bf16.mxu0 %v3511_v51  ;;  %2820 = vmatprep.mubr.bf16.mxu1 %v3511_v51 }
 0x2a6   : > { %3217 = vmatmul.mubr.msk.bf16.vlgmr.msra.gmra.mrb[44].mxu0 %vm821_vm0, %v2657_v46  ;;  %3222 = vmatmul.mubr.msk.bf16.vlgmr.msra.gmra.mrb[44].mxu1 %vm821_vm0, %v3218_v47 }
 0x321   : > { %v866_v48 = vpop.f32.mrb[0].mxu0  ;;  %v921_v49 = vpop.f32.mrb[0].mxu1 }
 0x322   : > { %v922_v50 = vadd.f32 %v921_v49, %v866_v48  ;;  %v868_v52 = vpop.f32.mrb[1].mxu0  ;;  %v923_v53 = vpop.f32.mrb[1].mxu1 }
 0x323   : > { %v924_v54 = vadd.f32 %v923_v53, %v868_v52  ;;  %v870_v0 = vpop.f32.mrb[2].mxu0  ;;  %v925_v51 = vpop.f32.mrb[2].mxu1 }
 0x324   : > { %v871_v1 = vpop.f32.mrb[3].mxu0  ;;  %v926_v3 = vpop.f32.mrb[3].mxu1 }
 0x329   : > { %v980_v55 = vpop.f32.mrb[4].mxu0  ;;  %v1137_v56 = vpop.f32.mrb[4].mxu1 }
 0x32a   : > { %v987_v57 = vadd.f32 %v980_v55, %v922_v50  ;;  %v982_v58 = vpop.f32.mrb[5].mxu0  ;;  %v1139_v59 = vpop.f32.mrb[5].mxu1 }
 0x32b   : > { %v988_v2 = vadd.f32 %v982_v58, %v924_v54  ;;  %v984_v25 = vpop.f32.mrb[6].mxu0  ;;  %v1141_v60 = vpop.f32.mrb[6].mxu1 }
 0x32c   : > { %v994_v61 = vadd.f32 %v3937_v4, %v987_v57  ;;  %v985_v62 = vpop.f32.mrb[7].mxu0  ;;  %v1142_v63 = vpop.f32.mrb[7].mxu1 }
 0x32d   : > { %v995_v6 = vadd.f32 %v3937_v4, %v988_v2 }
 0x32e   : > { %v996_v7 = vmax.f32 %v994_v61, 0.0 }
 0x32f   : > { %v997_v8 = vmax.f32 %v995_v6, 0.0 }
 0x331   : > { %v1000_v9 = vcombine.low %v996_v7, %v997_v8  ;;  %v1001_v10 = vcombine.high %v996_v7, %v997_v8  ;;  %v1192_v11 = vpop.f32.mrb[8].mxu0  ;;  %v1250_v12 = vpop.f32.mrb[8].mxu1 }
 0x332   : > { %v1193_v13 = vadd.f32 %v1192_v11, %v1137_v56  ;;  %v1194_v15 = vpop.f32.mrb[9].mxu0  ;;  %v1252_v16 = vpop.f32.mrb[9].mxu1 }
 0x333   : > { %v1008_v17 = vrot.slane %v1000_v9, %v3720_v14  ;;  %v1015_v18 = vrot.slane %v1001_v10, %v3720_v14  ;;  %v1195_v19 = vadd.f32 %v1194_v15, %v1139_v59  ;;  %v1196_v20 = vpop.f32.mrb[10].mxu0  ;;  %v1254_v21 = vpop.f32.mrb[10].mxu1 }
 0x334   : > { %v1257_v23 = vadd.f32 %v1250_v12, %v1193_v13  ;;  %v1197_v24 = vpop.f32.mrb[11].mxu0  ;;  %v1255_v26 = vpop.f32.mrb[11].mxu1 }
 0x335   : > { %v1016_v27 = vcombine.high %v1008_v17, %v1008_v17  ;;  %v1017_v28 = vcombine.high %v1015_v18, %v1015_v18  ;;  %v1024_v29 = vrot.slane %v1008_v17, %v3720_v14  ;;  %v1031_v30 = vrot.slane %v1015_v18, %v3720_v14 }
 0x336   : > { %v1259_v31 = vadd.f32 %v1257_v23, %v3937_v4  ;;  %v1258_v32 = vadd.f32 %v1252_v16, %v1195_v19 }
 0x337   : > { %v1038_v5 = vrot.slane %v1016_v27, %v3720_v14  ;;  %v1045_v33 = vrot.slane %v1017_v28, %v3720_v14  ;;  %v1046_v34 = vcombine.high %v1024_v29, %v1024_v29  ;;  %v1047_v35 = vcombine.high %v1031_v30, %v1031_v30  ;;  %1062 = vst.msk [vmem:[%s3703_s23] ss:$8 sm:$0x3] %vm3944_vm1, %v1024_v29 }
 0x338   : > { %3073 = vst.msk [vmem:[%s3703_s23 + $0x40] ss:$8 sm:$0x3] %vm3944_vm1, %v1031_v30  ;;  %v1261_v36 = vmax.f32 %v1259_v31, 0.0  ;;  %v1260_v37 = vadd.f32 %v1258_v32, %v3937_v4 }
 0x339   : > { %v1048_v38 = vcombine.high %v1038_v5, %v1038_v5  ;;  %v1049_v39 = vcombine.high %v1045_v33, %v1045_v33  ;;  %3070 = vst.msk [vmem:[%s3703_s23 + $0x10] ss:$8 sm:$0x3] %vm3944_vm1, %v1038_v5  ;;  %3071 = vst.msk [vmem:[%s3703_s23 + $0x20] ss:$8 sm:$0x3] %vm3944_vm1, %v1046_v34 }
 0x33a   : > { %3074 = vst.msk [vmem:[%s3703_s23 + $0x50] ss:$8 sm:$0x3] %vm3944_vm1, %v1045_v33  ;;  %3075 = vst.msk [vmem:[%s3703_s23 + $0x60] ss:$8 sm:$0x3] %vm3944_vm1, %v1047_v35 }
 0x33b   : > { %v1399_v40 = vpop.f32.mrb[12].mxu0  ;;  %v1454_v41 = vpop.f32.mrb[12].mxu1  ;;  %v1262_v42 = vmax.f32 %v1260_v37, 0.0  ;;  %3072 = vst.msk [vmem:[%s3703_s23 + $0x30] ss:$8 sm:$0x3] %vm3944_vm1, %v1048_v38 }
 0x33c   : > { %v1455_v43 = vadd.f32 %v1454_v41, %v1399_v40  ;;  %v1401_v44 = vpop.f32.mrb[13].mxu0  ;;  %v1456_v45 = vpop.f32.mrb[13].mxu1  ;;  %3076 = vst.msk [vmem:[%s3703_s23 + $0x70] ss:$8 sm:$0x3] %vm3944_vm1, %v1049_v39 }
 0x33d   : > { %v1457_v46 = vadd.f32 %v1456_v45, %v1401_v44  ;;  %v1403_v47 = vpop.f32.mrb[14].mxu0  ;;  %v1458_v48 = vpop.f32.mrb[14].mxu1  ;;  %v1265_v49 = vcombine.low %v1261_v36, %v1262_v42  ;;  %v1266_v50 = vcombine.high %v1261_v36, %v1262_v42 }
 0x33e   : > { %v1404_v52 = vpop.f32.mrb[15].mxu0  ;;  %v1459_v53 = vpop.f32.mrb[15].mxu1 }
 0x33f   : > { %v1273_v54 = vrot.slane %v1265_v49, %v3720_v14  ;;  %v1280_v0 = vrot.slane %v1266_v50, %v3720_v14 }
 0x341   : > { %v1281_v51 = vcombine.high %v1273_v54, %v1273_v54  ;;  %v1282_v1 = vcombine.high %v1280_v0, %v1280_v0  ;;  %v1289_v3 = vrot.slane %v1273_v54, %v3720_v14  ;;  %v1296_v55 = vrot.slane %v1280_v0, %v3720_v14  ;;  %v1512_v56 = vpop.f32.mrb[16].mxu0  ;;  %v1661_v57 = vpop.f32.mrb[16].mxu1 }
 0x342   : > { %v1514_v60 = vpop.f32.mrb[17].mxu0  ;;  %v1663_v61 = vpop.f32.mrb[17].mxu1  ;;  %v1519_v62 = vadd.f32 %v1512_v56, %v1455_v43 }
 0x343   : > { %v1303_v58 = vrot.slane %v1281_v51, %v3720_v14  ;;  %v1310_v59 = vrot.slane %v1282_v1, %v3720_v14  ;;  %v1311_v2 = vcombine.high %v1289_v3, %v1289_v3  ;;  %v1312_v25 = vcombine.high %v1296_v55, %v1296_v55  ;;  %3091 = vst.msk [vmem:[%s3703_s23 + $0x1] ss:$8 sm:$0x3] %vm3944_vm1, %v1289_v3  ;;  %v1516_v6 = vpop.f32.mrb[18].mxu0  ;;  %v1665_v7 = vpop.f32.mrb[18].mxu1 }
 0x344   : > { %3095 = vst.msk [vmem:[%s3703_s23 + $0x41] ss:$8 sm:$0x3] %vm3944_vm1, %v1296_v55  ;;  %v1520_v63 = vadd.f32 %v1514_v60, %v1457_v46  ;;  %v1517_v10 = vpop.f32.mrb[19].mxu0  ;;  %v1666_v11 = vpop.f32.mrb[19].mxu1  ;;  %v1521_v12 = vadd.f32 %v1519_v62, %v3937_v4 }
 0x345   : > { %v1313_v8 = vcombine.high %v1303_v58, %v1303_v58  ;;  %v1314_v9 = vcombine.high %v1310_v59, %v1310_v59  ;;  %3092 = vst.msk [vmem:[%s3703_s23 + $0x11] ss:$8 sm:$0x3] %vm3944_vm1, %v1303_v58  ;;  %3093 = vst.msk [vmem:[%s3703_s23 + $0x21] ss:$8 sm:$0x3] %vm3944_vm1, %v1311_v2 }
 0x346   : > { %3096 = vst.msk [vmem:[%s3703_s23 + $0x51] ss:$8 sm:$0x3] %vm3944_vm1, %v1310_v59  ;;  %3097 = vst.msk [vmem:[%s3703_s23 + $0x61] ss:$8 sm:$0x3] %vm3944_vm1, %v1312_v25  ;;  %v1522_v13 = vadd.f32 %v1520_v63, %v3937_v4 }
 0x347   : > { %3094 = vst.msk [vmem:[%s3703_s23 + $0x31] ss:$8 sm:$0x3] %vm3944_vm1, %v1313_v8  ;;  %3098 = vst.msk [vmem:[%s3703_s23 + $0x71] ss:$8 sm:$0x3] %vm3944_vm1, %v1314_v9 }
 0x348   : > { %v1523_v15 = vmax.f32 %v1521_v12, 0.0  ;;  %v1524_v16 = vmax.f32 %v1522_v13, 0.0 }
 0x349   : > { %v1716_v19 = vpop.f32.mrb[20].mxu0  ;;  %v1774_v20 = vpop.f32.mrb[20].mxu1 }
 0x34a   : > { %v1527_v17 = vcombine.low %v1523_v15, %v1524_v16  ;;  %v1528_v18 = vcombine.high %v1523_v15, %v1524_v16  ;;  %v1717_v21 = vadd.f32 %v1716_v19, %v1661_v57  ;;  %v1718_v23 = vpop.f32.mrb[21].mxu0  ;;  %v1776_v24 = vpop.f32.mrb[21].mxu1 }
 0x34b   : > { %v1719_v28 = vadd.f32 %v1718_v23, %v1663_v61  ;;  %v1720_v29 = vpop.f32.mrb[22].mxu0  ;;  %v1778_v30 = vpop.f32.mrb[22].mxu1 }
 0x34c   : > { %v1535_v26 = vrot.slane %v1527_v17, %v3720_v14  ;;  %v1542_v27 = vrot.slane %v1528_v18, %v3720_v14  ;;  %v1781_v31 = vadd.f32 %v1774_v20, %v1717_v21  ;;  %v1721_v32 = vpop.f32.mrb[23].mxu0  ;;  %v1779_v5 = vpop.f32.mrb[23].mxu1 }
 0x34d   : > { %v1782_v38 = vadd.f32 %v1776_v24, %v1719_v28 }
 0x34e   : > { %v1543_v33 = vcombine.high %v1535_v26, %v1535_v26  ;;  %v1544_v34 = vcombine.high %v1542_v27, %v1542_v27  ;;  %v1551_v35 = vrot.slane %v1535_v26, %v3720_v14  ;;  %v1558_v36 = vrot.slane %v1542_v27, %v3720_v14 }
 0x34f   : > { %v1783_v37 = vadd.f32 %v1781_v31, %v3937_v4  ;;  %v1784_v44 = vadd.f32 %v1782_v38, %v3937_v4 }
 0x350   : > { %v1565_v39 = vrot.slane %v1543_v33, %v3720_v14  ;;  %v1572_v40 = vrot.slane %v1544_v34, %v3720_v14  ;;  %v1573_v41 = vcombine.high %v1551_v35, %v1551_v35  ;;  %v1574_v42 = vcombine.high %v1558_v36, %v1558_v36  ;;  %3113 = vst.msk [vmem:[%s3703_s23 + $0x2] ss:$8 sm:$0x3] %vm3944_vm1, %v1551_v35 }
 0x351   : > { %3117 = vst.msk [vmem:[%s3703_s23 + $0x42] ss:$8 sm:$0x3] %vm3944_vm1, %v1558_v36  ;;  %v1785_v43 = vmax.f32 %v1783_v37, 0.0  ;;  %v1923_v47 = vpop.f32.mrb[24].mxu0  ;;  %v1978_v48 = vpop.f32.mrb[24].mxu1 }
 0x352   : > { %v1575_v45 = vcombine.high %v1565_v39, %v1565_v39  ;;  %v1576_v46 = vcombine.high %v1572_v40, %v1572_v40  ;;  %3114 = vst.msk [vmem:[%s3703_s23 + $0x12] ss:$8 sm:$0x3] %vm3944_vm1, %v1565_v39  ;;  %3115 = vst.msk [vmem:[%s3703_s23 + $0x22] ss:$8 sm:$0x3] %vm3944_vm1, %v1573_v41  ;;  %v1979_v50 = vadd.f32 %v1978_v48, %v1923_v47 }
 0x353   : > { %3118 = vst.msk [vmem:[%s3703_s23 + $0x52] ss:$8 sm:$0x3] %vm3944_vm1, %v1572_v40  ;;  %3119 = vst.msk [vmem:[%s3703_s23 + $0x62] ss:$8 sm:$0x3] %vm3944_vm1, %v1574_v42 }
 0x354   : > { %v1786_v49 = vmax.f32 %v1784_v44, 0.0  ;;  %v1925_v52 = vpop.f32.mrb[25].mxu0  ;;  %v1980_v53 = vpop.f32.mrb[25].mxu1  ;;  %3116 = vst.msk [vmem:[%s3703_s23 + $0x32] ss:$8 sm:$0x3] %vm3944_vm1, %v1575_v45 }
 0x355   : > { %3120 = vst.msk [vmem:[%s3703_s23 + $0x72] ss:$8 sm:$0x3] %vm3944_vm1, %v1576_v46  ;;  %v1981_v54 = vadd.f32 %v1980_v53, %v1925_v52  ;;  %v1927_v0 = vpop.f32.mrb[26].mxu0  ;;  %v1982_v51 = vpop.f32.mrb[26].mxu1 }
 0x356   : > { %v1789_v1 = vcombine.low %v1785_v43, %v1786_v49  ;;  %v1790_v3 = vcombine.high %v1785_v43, %v1786_v49  ;;  %v1928_v55 = vpop.f32.mrb[27].mxu0  ;;  %v1983_v56 = vpop.f32.mrb[27].mxu1 }
 0x358   : > { %v1797_v57 = vrot.slane %v1789_v1, %v3720_v14  ;;  %v1804_v58 = vrot.slane %v1790_v3, %v3720_v14 }
 0x359   : > { %v2036_v61 = vpop.f32.mrb[28].mxu0  ;;  %v2185_v62 = vpop.f32.mrb[28].mxu1 }
 0x35a   : > { %v1805_v59 = vcombine.high %v1797_v57, %v1797_v57  ;;  %v1806_v2 = vcombine.high %v1804_v58, %v1804_v58  ;;  %v1813_v25 = vrot.slane %v1797_v57, %v3720_v14  ;;  %v1820_v60 = vrot.slane %v1804_v58, %v3720_v14  ;;  %v2038_v9 = vpop.f32.mrb[29].mxu0  ;;  %v2187_v10 = vpop.f32.mrb[29].mxu1 }
 0x35b   : > { %v2043_v11 = vadd.f32 %v2036_v61, %v1979_v50  ;;  %v2044_v12 = vadd.f32 %v2038_v9, %v1981_v54  ;;  %v2040_v13 = vpop.f32.mrb[30].mxu0  ;;  %v2189_v15 = vpop.f32.mrb[30].mxu1 }
 0x35c   : > { %v1827_v63 = vrot.slane %v1805_v59, %v3720_v14  ;;  %v1834_v6 = vrot.slane %v1806_v2, %v3720_v14  ;;  %v1835_v7 = vcombine.high %v1813_v25, %v1813_v25  ;;  %v1836_v8 = vcombine.high %v1820_v60, %v1820_v60  ;;  %3135 = vst.msk [vmem:[%s3703_s23 + $0x3] ss:$8 sm:$0x3] %vm3944_vm1, %v1813_v25  ;;  %v2041_v18 = vpop.f32.mrb[31].mxu0  ;;  %v2190_v19 = vpop.f32.mrb[31].mxu1 }
 0x35d   : > { %3139 = vst.msk [vmem:[%s3703_s23 + $0x43] ss:$8 sm:$0x3] %vm3944_vm1, %v1820_v60  ;;  %v2045_v20 = vadd.f32 %v2043_v11, %v3937_v4  ;;  %v2046_v21 = vadd.f32 %v2044_v12, %v3937_v4 }
 0x35e   : > { %v1837_v16 = vcombine.high %v1827_v63, %v1827_v63  ;;  %v1838_v17 = vcombine.high %v1834_v6, %v1834_v6  ;;  %3136 = vst.msk [vmem:[%s3703_s23 + $0x13] ss:$8 sm:$0x3] %vm3944_vm1, %v1827_v63  ;;  %3137 = vst.msk [vmem:[%s3703_s23 + $0x23] ss:$8 sm:$0x3] %vm3944_vm1, %v1835_v7 }
 0x35f   : > { %3140 = vst.msk [vmem:[%s3703_s23 + $0x53] ss:$8 sm:$0x3] %vm3944_vm1, %v1834_v6  ;;  %3141 = vst.msk [vmem:[%s3703_s23 + $0x63] ss:$8 sm:$0x3] %vm3944_vm1, %v1836_v8 }
 0x360   : > { %3138 = vst.msk [vmem:[%s3703_s23 + $0x33] ss:$8 sm:$0x3] %vm3944_vm1, %v1837_v16  ;;  %3142 = vst.msk [vmem:[%s3703_s23 + $0x73] ss:$8 sm:$0x3] %vm3944_vm1, %v1838_v17 }
 0x361   : > { %v2047_v23 = vmax.f32 %v2045_v20, 0.0  ;;  %v2048_v24 = vmax.f32 %v2046_v21, 0.0  ;;  %v2240_v28 = vpop.f32.mrb[32].mxu0  ;;  %v2298_v29 = vpop.f32.mrb[32].mxu1 }
 0x362   : > { %v2241_v30 = vadd.f32 %v2240_v28, %v2185_v62  ;;  %v2242_v31 = vpop.f32.mrb[33].mxu0  ;;  %v2300_v32 = vpop.f32.mrb[33].mxu1 }
 0x363   : > { %v2051_v26 = vcombine.low %v2047_v23, %v2048_v24  ;;  %v2052_v27 = vcombine.high %v2047_v23, %v2048_v24  ;;  %v2243_v34 = vadd.f32 %v2242_v31, %v2187_v10  ;;  %v2244_v35 = vpop.f32.mrb[34].mxu0  ;;  %v2302_v36 = vpop.f32.mrb[34].mxu1 }
 0x364   : > { %v2305_v37 = vadd.f32 %v2298_v29, %v2241_v30  ;;  %v2245_v38 = vpop.f32.mrb[35].mxu0  ;;  %v2303_v39 = vpop.f32.mrb[35].mxu1 }
 0x365   : > { %v2059_v5 = vrot.slane %v2051_v26, %v3720_v14  ;;  %v2066_v33 = vrot.slane %v2052_v27, %v3720_v14  ;;  %v2306_v45 = vadd.f32 %v2300_v32, %v2243_v34 }
 0x366   : > { %v2307_v44 = vadd.f32 %v2305_v37, %v3937_v4 }
 0x367   : > { %v2067_v40 = vcombine.high %v2059_v5, %v2059_v5  ;;  %v2068_v41 = vcombine.high %v2066_v33, %v2066_v33  ;;  %v2075_v42 = vrot.slane %v2059_v5, %v3720_v14  ;;  %v2082_v43 = vrot.slane %v2066_v33, %v3720_v14 }
 0x368   : > { %v2309_v50 = vmax.f32 %v2307_v44, 0.0  ;;  %v2308_v52 = vadd.f32 %v2306_v45, %v3937_v4 }
 0x369   : > { %v2089_v46 = vrot.slane %v2067_v40, %v3720_v14  ;;  %v2096_v47 = vrot.slane %v2068_v41, %v3720_v14  ;;  %v2097_v48 = vcombine.high %v2075_v42, %v2075_v42  ;;  %v2098_v49 = vcombine.high %v2082_v43, %v2082_v43  ;;  %3157 = vst.msk [vmem:[%s3703_s23 + $0x4] ss:$8 sm:$0x3] %vm3944_vm1, %v2075_v42  ;;  %v2447_v0 = vpop.f32.mrb[36].mxu0  ;;  %v2502_v51 = vpop.f32.mrb[36].mxu1 }
 0x36a   : > { %3161 = vst.msk [vmem:[%s3703_s23 + $0x44] ss:$8 sm:$0x3] %vm3944_vm1, %v2082_v43  ;;  %v2310_v1 = vmax.f32 %v2308_v52, 0.0  ;;  %v2503_v3 = vadd.f32 %v2502_v51, %v2447_v0  ;;  %v2449_v55 = vpop.f32.mrb[37].mxu0  ;;  %v2504_v56 = vpop.f32.mrb[37].mxu1 }
 0x36b   : > { %v2099_v53 = vcombine.high %v2089_v46, %v2089_v46  ;;  %v2100_v54 = vcombine.high %v2096_v47, %v2096_v47  ;;  %3158 = vst.msk [vmem:[%s3703_s23 + $0x14] ss:$8 sm:$0x3] %vm3944_vm1, %v2089_v46  ;;  %3159 = vst.msk [vmem:[%s3703_s23 + $0x24] ss:$8 sm:$0x3] %vm3944_vm1, %v2097_v48  ;;  %v2505_v57 = vadd.f32 %v2504_v56, %v2449_v55 }
 0x36c   : > { %3162 = vst.msk [vmem:[%s3703_s23 + $0x54] ss:$8 sm:$0x3] %vm3944_vm1, %v2096_v47  ;;  %3163 = vst.msk [vmem:[%s3703_s23 + $0x64] ss:$8 sm:$0x3] %vm3944_vm1, %v2098_v49  ;;  %v2313_v2 = vcombine.low %v2309_v50, %v2310_v1  ;;  %v2314_v25 = vcombine.high %v2309_v50, %v2310_v1 }
 0x36d   : > { %3160 = vst.msk [vmem:[%s3703_s23 + $0x34] ss:$8 sm:$0x3] %vm3944_vm1, %v2099_v53  ;;  %3164 = vst.msk [vmem:[%s3703_s23 + $0x74] ss:$8 sm:$0x3] %vm3944_vm1, %v2100_v54 }
 0x36e   : > { %v2451_v58 = vpop.f32.mrb[38].mxu0  ;;  %v2506_v59 = vpop.f32.mrb[38].mxu1  ;;  %v2321_v62 = vrot.slane %v2313_v2, %v3720_v14  ;;  %v2328_v63 = vrot.slane %v2314_v25, %v3720_v14 }
 0x36f   : > { %v2452_v60 = vpop.f32.mrb[39].mxu0  ;;  %v2507_v61 = vpop.f32.mrb[39].mxu1 }
 0x370   : > { %v2329_v6 = vcombine.high %v2321_v62, %v2321_v62  ;;  %v2330_v7 = vcombine.high %v2328_v63, %v2328_v63  ;;  %v2337_v8 = vrot.slane %v2321_v62, %v3720_v14  ;;  %v2344_v9 = vrot.slane %v2328_v63, %v3720_v14 }
 0x371   : > { %v2560_v10 = vpop.f32.mrb[40].mxu0  ;;  %v2709_v11 = vpop.f32.mrb[40].mxu1 }
 0x372   : > { %v2351_v12 = vrot.slane %v2329_v6, %v3720_v14  ;;  %v2358_v13 = vrot.slane %v2330_v7, %v3720_v14  ;;  %v2359_v15 = vcombine.high %v2337_v8, %v2337_v8  ;;  %v2360_v16 = vcombine.high %v2344_v9, %v2344_v9  ;;  %3179 = vst.msk [vmem:[%s3703_s23 + $0x5] ss:$8 sm:$0x3] %vm3944_vm1, %v2337_v8  ;;  %v2562_v17 = vpop.f32.mrb[41].mxu0  ;;  %v2711_v18 = vpop.f32.mrb[41].mxu1 }
 0x373   : > { %3183 = vst.msk [vmem:[%s3703_s23 + $0x45] ss:$8 sm:$0x3] %vm3944_vm1, %v2344_v9  ;;  %v2567_v19 = vadd.f32 %v2560_v10, %v2503_v3  ;;  %v2568_v20 = vadd.f32 %v2562_v17, %v2505_v57  ;;  %v2564_v21 = vpop.f32.mrb[42].mxu0  ;;  %v2713_v23 = vpop.f32.mrb[42].mxu1 }
 0x374   : > { %v2361_v24 = vcombine.high %v2351_v12, %v2351_v12  ;;  %v2362_v26 = vcombine.high %v2358_v13, %v2358_v13  ;;  %3180 = vst.msk [vmem:[%s3703_s23 + $0x15] ss:$8 sm:$0x3] %vm3944_vm1, %v2351_v12  ;;  %3181 = vst.msk [vmem:[%s3703_s23 + $0x25] ss:$8 sm:$0x3] %vm3944_vm1, %v2359_v15 }
 0x375   : > { %3184 = vst.msk [vmem:[%s3703_s23 + $0x55] ss:$8 sm:$0x3] %vm3944_vm1, %v2358_v13  ;;  %3185 = vst.msk [vmem:[%s3703_s23 + $0x65] ss:$8 sm:$0x3] %vm3944_vm1, %v2360_v16  ;;  %v2569_v29 = vadd.f32 %v2567_v19, %v3937_v4  ;;  %v2570_v30 = vadd.f32 %v2568_v20, %v3937_v4 }
 0x376   : > { %v2565_v27 = vpop.f32.mrb[43].mxu0  ;;  %v2714_v28 = vpop.f32.mrb[43].mxu1  ;;  %3182 = vst.msk [vmem:[%s3703_s23 + $0x35] ss:$8 sm:$0x3] %vm3944_vm1, %v2361_v24 }
 0x377   : > { %3186 = vst.msk [vmem:[%s3703_s23 + $0x75] ss:$8 sm:$0x3] %vm3944_vm1, %v2362_v26  ;;  %v2571_v31 = vmax.f32 %v2569_v29, 0.0  ;;  %v2572_v32 = vmax.f32 %v2570_v30, 0.0 }
 0x379   : > { %v2575_v5 = vcombine.low %v2571_v31, %v2572_v32  ;;  %v2576_v33 = vcombine.high %v2571_v31, %v2572_v32  ;;  %v2764_v34 = vpop.f32.mrb[44].mxu0  ;;  %v2822_v35 = vpop.f32.mrb[44].mxu1 }
 0x37a   : > { %v2765_v36 = vadd.f32 %v2764_v34, %v2709_v11  ;;  %v2766_v37 = vpop.f32.mrb[45].mxu0  ;;  %v2824_v38 = vpop.f32.mrb[45].mxu1 }
 0x37b   : > { %v2583_v39 = vrot.slane %v2575_v5, %v3720_v14  ;;  %v2590_v40 = vrot.slane %v2576_v33, %v3720_v14  ;;  %v2767_v41 = vadd.f32 %v2766_v37, %v2711_v18  ;;  %v2768_v42 = vpop.f32.mrb[46].mxu0  ;;  %v2826_v43 = vpop.f32.mrb[46].mxu1 }
 0x37c   : > { %v2829_v44 = vadd.f32 %v2822_v35, %v2765_v36  ;;  %v2769_v45 = vpop.f32.mrb[47].mxu0  ;;  %v2827_v46 = vpop.f32.mrb[47].mxu1 }
 0x37d   : > { %v2591_v47 = vcombine.high %v2583_v39, %v2583_v39  ;;  %v2592_v48 = vcombine.high %v2590_v40, %v2590_v40  ;;  %v2599_v49 = vrot.slane %v2583_v39, %v3720_v14  ;;  %v2606_v50 = vrot.slane %v2590_v40, %v3720_v14 }
 0x37e   : > { %v2831_v52 = vadd.f32 %v2829_v44, %v3937_v4  ;;  %v2830_v53 = vadd.f32 %v2824_v38, %v2767_v41 }
 0x37f   : > { %v2613_v54 = vrot.slane %v2591_v47, %v3720_v14  ;;  %v2620_v0 = vrot.slane %v2592_v48, %v3720_v14  ;;  %v2621_v51 = vcombine.high %v2599_v49, %v2599_v49  ;;  %v2622_v1 = vcombine.high %v2606_v50, %v2606_v50  ;;  %3201 = vst.msk [vmem:[%s3703_s23 + $0x6] ss:$8 sm:$0x3] %vm3944_vm1, %v2599_v49 }
 0x380   : > { %3205 = vst.msk [vmem:[%s3703_s23 + $0x46] ss:$8 sm:$0x3] %vm3944_vm1, %v2606_v50  ;;  %v2833_v3 = vmax.f32 %v2831_v52, 0.0  ;;  %v2832_v55 = vadd.f32 %v2830_v53, %v3937_v4 }
 0x381   : > { %v2623_v56 = vcombine.high %v2613_v54, %v2613_v54  ;;  %v2624_v57 = vcombine.high %v2620_v0, %v2620_v0  ;;  %3202 = vst.msk [vmem:[%s3703_s23 + $0x16] ss:$8 sm:$0x3] %vm3944_vm1, %v2613_v54  ;;  %3203 = vst.msk [vmem:[%s3703_s23 + $0x26] ss:$8 sm:$0x3] %vm3944_vm1, %v2621_v51 }
 0x382   : > { %3206 = vst.msk [vmem:[%s3703_s23 + $0x56] ss:$8 sm:$0x3] %vm3944_vm1, %v2620_v0  ;;  %3207 = vst.msk [vmem:[%s3703_s23 + $0x66] ss:$8 sm:$0x3] %vm3944_vm1, %v2622_v1 }
 0x383   : > { %v2834_v58 = vmax.f32 %v2832_v55, 0.0  ;;  %3204 = vst.msk [vmem:[%s3703_s23 + $0x36] ss:$8 sm:$0x3] %vm3944_vm1, %v2623_v56 }
 0x384   : > { %3208 = vst.msk [vmem:[%s3703_s23 + $0x76] ss:$8 sm:$0x3] %vm3944_vm1, %v2624_v57 }
 0x385   : > { %v2837_v4 = vcombine.low %v2833_v3, %v2834_v58  ;;  %v2838_v59 = vcombine.high %v2833_v3, %v2834_v58 }
 0x387   : > { %v2845_v2 = vrot.slane %v2837_v4, %v3720_v14  ;;  %v2852_v25 = vrot.slane %v2838_v59, %v3720_v14 }
 0x389   : > { %v2853_v60 = vcombine.high %v2845_v2, %v2845_v2  ;;  %v2854_v61 = vcombine.high %v2852_v25, %v2852_v25  ;;  %v2861_v62 = vrot.slane %v2845_v2, %v3720_v14  ;;  %v2868_v63 = vrot.slane %v2852_v25, %v3720_v14 }
 0x38b   : > { %v2875_v6 = vrot.slane %v2853_v60, %v3720_v14  ;;  %v2882_v7 = vrot.slane %v2854_v61, %v3720_v14  ;;  %v2883_v8 = vcombine.high %v2861_v62, %v2861_v62  ;;  %v2884_v9 = vcombine.high %v2868_v63, %v2868_v63  ;;  %3223 = vst.msk [vmem:[%s3703_s23 + $0x7] ss:$8 sm:$0x3] %vm3944_vm1, %v2861_v62 }
 0x38c   : > { %3227 = vst.msk [vmem:[%s3703_s23 + $0x47] ss:$8 sm:$0x3] %vm3944_vm1, %v2868_v63 }
 0x38d   : > { %v2885_v10 = vcombine.high %v2875_v6, %v2875_v6  ;;  %v2886_v14 = vcombine.high %v2882_v7, %v2882_v7  ;;  %3224 = vst.msk [vmem:[%s3703_s23 + $0x17] ss:$8 sm:$0x3] %vm3944_vm1, %v2875_v6  ;;  %3225 = vst.msk [vmem:[%s3703_s23 + $0x27] ss:$8 sm:$0x3] %vm3944_vm1, %v2883_v8 }
 0x38e   : > { %3228 = vst.msk [vmem:[%s3703_s23 + $0x57] ss:$8 sm:$0x3] %vm3944_vm1, %v2882_v7  ;;  %3229 = vst.msk [vmem:[%s3703_s23 + $0x67] ss:$8 sm:$0x3] %vm3944_vm1, %v2884_v9 }
 0x38f   : > { %3226 = vst.msk [vmem:[%s3703_s23 + $0x37] ss:$8 sm:$0x3] %vm3944_vm1, %v2885_v10  ;;  %3230 = vst.msk [vmem:[%s3703_s23 + $0x77] ss:$8 sm:$0x3] %vm3944_vm1, %v2886_v14 }
 0x390   : > { %3413 = shalt.err (!%p3410_p3)
}
 0x391   : > { %s3414_s23 = scalar_lea.hbm %s4187_s27, 2048  ;;  %s3418_s18 = scalar_lea.hbm %s4263_s7, 4096 }
 0x392   : > { %p3415_p8 = scmp.ne.s32.totalorder %s4187_s27, %s3414_s23  ;;  %p3419_p0 = scmp.lt.u32.totalorder %s4187_s27, %s4263_s7 }
 0x393   : > { %p3420_p5 = scmp.lt.u32.totalorder %s3418_s18, %s3414_s23  ;;  %p3422_p2 = scmp.lt.u32.totalorder %s3414_s23, %s4187_s27 }
 0x394   : > { %p3416_p9 = pnand %p3415_p8, %p4273_p4 }
 0x395   : > { %p3421_p13 = por %p3420_p5, %p3419_p0 }
 0x396   : > { %p3417_p11 = pneg %p3416_p9 }
 0x397   : > { %p3423_p6 = por %p3422_p2, %p3421_p13 }
 0x399   : > { %p3424_p7 = pnand %p3423_p6, %p3417_p11 }
 0x39b   : > { %3427 = shalt.err (!%p3424_p7)
}
 0x39c   : > { %s3513_s11 = smov 256   ;;  %s3514_s21 = smov 16  }
 0x39d   : > { %3247 = dma.vmem_to_hbm [thread:$0]  (%p4273_p4), %s4189_s17, 2048, %s4187_s27, %s2920_s12, %s3513_s11, %s3513_s11, %s3514_s21  }
 0x39e PF: > { %s2950_s30 = sand.u32 1, %s3466_s24   ;;  %p4274_p10 = scmp.ne.s32.totalorder %s4268_s16, 0 }
 0x39f   : > { %p4275_p12 = scmp.ge.s32.totalorder %s3486_s29, 2  ;;  %s2951_s8 = scalar_lea.sflag [#allocation6], %s2950_s30 }
 0x3a1   : > { %p3254_p1 = pnand %p4275_p12, %p4274_p10 }
 0x3a3   : > { %3461 = dma.done.wait (!%p3254_p1), %s2951_s8, 2048  }
 0x3a4   : > { %3463 = vsyncadd (!%p3254_p1), %s2951_s8, 4294965248  ;;  %s23_s29 = sadd.s32 1, %s3486_s29   ;;  %s4276_s24 = smov %s3470_s25 }
 0x3a5   : > { %p20_p3 = scmp.ge.s32.totalorder %s23_s29, 4   ;;  %s4277_s25 = smov %s3474_s26 }
 0x3a6   : > { %s4278_s26 = smov %s3611_s15  ;;  %s4279_s27 = smov %s3482_s28 }
 0x3a7   : > { %s4280_s28 = smov %s4282_s9  ;;  %22 = sbr.rel (!%p20_p3) target bundleno = 6 (0x6), region = 187 }
 0x3ae   :  { %2956 = vsyncpa [#allocation5], 1 }
 0x3af   :  { %2958 = vsyncpa [#allocation5 + $0x1], 1 }
 0x3b0   :  { %2959 = vsyncpa [#allocation6], 1 }
 0x3b1   :  { %2961 = vsyncpa [#allocation6 + $0x1], 1 }

</bundles_post_ra>
